<compile_context>
chip_gen: v6e
topology: v6e:2x2x1
jax: 0.10.0
libtpu: 0.0.40
codegen_flags: <defaults>
</compile_context>

<pallas_src>
import functools

import numpy as np
import jax
import jax.numpy as jnp
from jax.experimental import pallas as pl
from jax.experimental.pallas import tpu as pltpu

N_MELS = 64


# ----------------------------- host-side constants (numpy, float64) -------------------

def _round_up(x, m):
    return ((x + m - 1) // m) * m


def _hz_to_mel(f):
    return 2595.0 * np.log10(1.0 + f / 700.0)


def _mel_to_hz(m):
    return 700.0 * (10.0 ** (m / 2595.0) - 1.0)


def melscale_fbanks(n_freqs, f_min, f_max, n_mels, sample_rate):
    """torchaudio.functional.melscale_fbanks, htk scale, norm=None. -> (n_freqs, n_mels) f64."""
    all_freqs = np.linspace(0.0, sample_rate // 2, n_freqs)
    m_pts = np.linspace(_hz_to_mel(f_min), _hz_to_mel(f_max), n_mels + 2)
    f_pts = _mel_to_hz(m_pts)
    f_diff = f_pts[1:] - f_pts[:-1]                       # (n_mels + 1,)
    slopes = f_pts[None, :] - all_freqs[:, None]          # (n_freqs, n_mels + 2)
    down = -slopes[:, :-2] / f_diff[:-1]
    up = slopes[:, 2:] / f_diff[1:]
    return np.maximum(0.0, np.minimum(down, up))


def hann_window(n):
    """torch.hann_window(periodic=True), float64."""
    i = np.arange(n, dtype=np.float64)
    return 0.5 - 0.5 * np.cos(2.0 * np.pi * i / n)


def rdft_matrices(n_fft):
    """Real-DFT basis: (n_fft, n_fft//2+1) cos / sin matrices, float64."""
    n_freq = n_fft // 2 + 1
    n = np.arange(n_fft, dtype=np.float64)[:, None]
    k = np.arange(n_freq, dtype=np.float64)[None, :]
    ang = 2.0 * np.pi * n * k / float(n_fft)
    return np.cos(ang), np.sin(ang)


@functools.lru_cache(maxsize=None)
def build_scale_constants(n_fft, sample_rate, n_mels=N_MELS):
    """Packed, window-folded constants for one scale (numpy float32).

    cs : (n_fft, W)  [diag(w)@cos | diag(w)@sin | 0], W = round_up(2*n_freq, 128)
                     (packed halves: only ONE lane-padding block instead of one per half).
    fb : (W, 128)    mel filterbank rows duplicated over the cos and sin halves so that
                     (z*z) @ fb == (re^2 + im^2) @ fb_small; padded rows / mel columns
                     are zero and contribute exactly 0 to the loss.
    """
    n_freq = n_fft // 2 + 1
    wpad = _round_up(2 * n_freq, 128)
    cos_m, sin_m = rdft_matrices(n_fft)
    win = hann_window(n_fft)[:, None]
    cs = np.zeros((n_fft, wpad), dtype=np.float64)
    cs[:, :n_freq] = win * cos_m
    cs[:, n_freq:2 * n_freq] = win * sin_m
    fb_small = melscale_fbanks(n_freq, 0.0, float(sample_rate // 2), n_mels, sample_rate)
    fb = np.zeros((wpad, 128), dtype=np.float64)
    fb[:n_freq, :n_mels] = fb_small
    fb[n_freq:2 * n_freq, :n_mels] = fb_small
    return cs.astype(np.float32), fb.astype(np.float32)


def build_reference_constants(n_fft, sample_rate, n_mels=N_MELS):
    """Unfolded / unpadded constants for the pure-JAX reference path."""
    n_freq = n_fft // 2 + 1
    cos_m, sin_m = rdft_matrices(n_fft)
    win = hann_window(n_fft)
    fb = melscale_fbanks(n_freq, 0.0, float(sample_rate // 2), n_mels, sample_rate)
    return (jnp.asarray(win.astype(np.float32))[None, :],
            jnp.asarray(cos_m.astype(np.float32)),
            jnp.asarray(sin_m.astype(np.float32)),
            jnp.asarray(fb.astype(np.float32)))


def frame_signal(x, n_fft, hop):
    """Reflect-pad (center=True) and frame -> (B * n_frames, n_fft)."""
    b, t = x.shape
    pad = n_fft // 2
    xp = jnp.pad(x, ((0, 0), (pad, pad)), mode="reflect")
    n_frames = 1 + t // hop
    idx = (jnp.arange(n_frames) * hop)[:, None] + jnp.arange(n_fft)[None, :]
    frames = xp[:, idx]                                   # (B, n_frames, n_fft)
    return frames.reshape(b * n_frames, n_fft)


# ----------------------------- Pallas kernel (per scale) ------------------------------

def make_scale_kernel(alpha, eps):
    def kernel(xf_ref, yf_ref, cs_ref, fb_ref, o_ref):
        cs = cs_ref[...]
        fb = fb_ref[...]

        # Windowed rDFT (window folded into cs). bf16 x bf16 is MXU-native; f32 acc.
        zx = jnp.dot(xf_ref[...], cs, preferred_element_type=jnp.float32)
        zy = jnp.dot(yf_ref[...], cs, preferred_element_type=jnp.float32)

        # Squared DFT lanes are [re^2 | im^2 | 0]; fb's duplicated rows fold re+im and
        # its zero rows/columns absorb the lane padding -> one mel matmul per signal,
        # no slicing, no roll, no scratch copies.
        mx = jnp.dot((zx * zx).astype(fb.dtype), fb, preferred_element_type=jnp.float32)
        my = jnp.dot((zy * zy).astype(fb.dtype), fb, preferred_element_type=jnp.float32)

        l1 = jnp.sum(jnp.abs(mx - my))
        ld = jnp.log((mx + eps) / (my + eps))             # single EUP log per element
        l2 = jnp.sum(ld * ld)

        # Per-tile partial (lane-dense (1,1,128) block); reduced + scaled outside.
        o_ref[...] = jnp.full((1, 1, 128), l1 + alpha * l2, dtype=jnp.float32)

    return kernel


def _choose_tm(n_fft, bn, itemsize):
    """Divisor-aware row-tile size: multiple of 8, VMEM-bounded, minimal row padding."""
    budget = (1 << 19) if itemsize <= 2 else (1 << 18)    # bf16 tiles are half the bytes
    cap = max(128, min(2048, budget // n_fft))
    cap = min(cap, _round_up(max(bn, 1), 8))
    num_tiles = -(-bn // cap)
    tm = _round_up(-(-bn // num_tiles), 8)                # balance tiles -> tiny padding
    return max(8, tm)


def _vmem_limit_bytes(tm, n_fft, wpad, itemsize):
    """Per-scale VMEM budget. Estimated pessimistically (as if constants were still
    double-buffered) and capped at 48 MiB to leave headroom on v7x's 64 MiB per-TC VMEM."""
    cs_b = n_fft * wpad * itemsize
    fb_b = wpad * 128 * itemsize
    tiles_b = 2 * 2 * tm * n_fft * itemsize               # x/y frame tiles, double-buffered
    work_b = 6 * tm * wpad * 4                            # zx/zy, squares, casts (f32)
    est = 2 * (cs_b + fb_b) + tiles_b + work_b + (8 << 20)
    return int(min(max(est, 32 << 20), 48 << 20))


def scale_loss_pallas(xf, yf, cs, fb, alpha, eps, n_mels=N_MELS):
    bn, n_fft = xf.shape
    wpad = fb.shape[0]
    itemsize = jnp.dtype(xf.dtype).itemsize
    tm = _choose_tm(n_fft, bn, itemsize)
    num_tiles = -(-bn // tm)
    pad_rows = num_tiles * tm - bn
    if pad_rows:
        # Zero frames give zero mel power in both x and y -> zero loss contribution.
        xf = jnp.pad(xf, ((0, pad_rows), (0, 0)))
        yf = jnp.pad(yf, ((0, pad_rows), (0, 0)))

    kernel = make_scale_kernel(float(alpha), float(eps))

    partials = pl.pallas_call(
        kernel,
        out_shape=jax.ShapeDtypeStruct((num_tiles, 1, 128), jnp.float32),
        grid=(num_tiles,),
        in_specs=[
            pl.BlockSpec((tm, n_fft), lambda i: (i, 0)),      # x frame tile (streamed)
            pl.BlockSpec((tm, n_fft), lambda i: (i, 0)),      # y frame tile (streamed)
            # Constant-index residents: single buffer instead of the default 2 copies.
            pl.BlockSpec(cs.shape, lambda i: (0, 0), pipeline_mode=pl.Buffered(1)),
            pl.BlockSpec(fb.shape, lambda i: (0, 0), pipeline_mode=pl.Buffered(1)),
        ],
        out_specs=pl.BlockSpec((1, 1, 128), lambda i: (i, 0, 0)),
        compiler_params=pltpu.CompilerParams(
            dimension_semantics=("parallel",),                # megacore splits row tiles
            vmem_limit_bytes=_vmem_limit_bytes(tm, n_fft, wpad, itemsize),
        ),
    )(xf, yf, cs, fb)

    inv_count = 1.0 / float(bn * n_mels)                     # true (unpadded) mean divisor
    return jnp.sum(partials[:, 0, 0]) * inv_count


# ----------------------------- module equivalent --------------------------------------

def reconstruction_loss2(inp, tgt, sample_rate, eps=1e-5, use_pallas=True,
                         compute_dtype=jnp.bfloat16):
    """Equivalent of ReconstructionLoss2.forward(input, target) for equal-length inputs.

    compute_dtype: dtype of the MXU matmul inputs in the Pallas kernels. bfloat16
    (default) is MXU-native on v5e/v6e/v7x (f32 matmuls are emulated) and halves the
    streamed-frame HBM traffic; accumulation is always float32. Pass jnp.float32 for
    reference-grade numerics.

    # TODO(synk): the PyTorch shape-mismatch branch (x = x[:, y.shape[-1]]) is an indexing
    # bug that never triggers for equal-length input/target; not reproduced here.
    # TODO(synk): frames are still materialized in HBM with 4x hop overlap per scale; an
    # in-kernel framing variant (padded waveform via memory_space=pl.ANY + manual DMA)
    # would cut that traffic ~4x and mainly helps v5e / the small scales.
    # TODO(synk): the small scales (n_fft <= 256) could be fused into one pallas_call to
    # amortize per-step overhead and fill both v7x TensorCores when grids are 1-2 tiles.
    """
    total = jnp.float32(0.0)
    for i in range(6, 12):
        n_fft = int(2 ** i)
        hop = n_fft // 4
        alpha = (2 ** i / 2) ** 0.5

        xf = frame_signal(inp, n_fft, hop)
        yf = frame_signal(tgt, n_fft, hop)

        if use_pallas:
            cs_np, fb_np = build_scale_constants(n_fft, sample_rate)
            cs = jnp.asarray(cs_np).astype(compute_dtype)
            fb = jnp.asarray(fb_np).astype(compute_dtype)
            total = total + scale_loss_pallas(
                xf.astype(compute_dtype), yf.astype(compute_dtype), cs, fb, alpha, eps)
        else:
            win, cosm, sinm, fb = build_reference_constants(n_fft, sample_rate)
            hi = jax.lax.Precision.HIGHEST

            def melspec(f):
                fw = f * win
                re = jnp.dot(fw, cosm, precision=hi)
                im = jnp.dot(fw, sinm, precision=hi)
                return jnp.dot(re * re + im * im, fb, precision=hi)

            mx = melspec(xf)
            my = melspec(yf)
            total = total + jnp.mean(jnp.abs(mx - my))
            total = total + alpha * jnp.mean(
                jnp.square(jnp.log(mx + eps) - jnp.log(my + eps)))
    return total


# ----------------------------- demo ----------------------------------------------------

if __name__ == "__main__":
    sample_rate = 16000
    B, T = 2, 4096                                        # small shapes, T > n_fft_max

    key = jax.random.PRNGKey(0)
    k1, k2 = jax.random.split(key)
    inp = 0.1 * jax.random.normal(k1, (B, T), dtype=jnp.float32)
    tgt = 0.1 * jax.random.normal(k2, (B, T), dtype=jnp.float32)

    # bf16 MXU path (default) and f32 kernel path.
    loss_bf16 = jax.block_until_ready(reconstruction_loss2(inp, tgt, sample_rate))
    loss_f32 = jax.block_until_ready(
        reconstruction_loss2(inp, tgt, sample_rate, compute_dtype=jnp.float32))

    # pure-JAX (unfolded / unpadded, HIGHEST precision) reference
    ref = jax.block_until_ready(
        reconstruction_loss2(inp, tgt, sample_rate, use_pallas=False))

    assert np.isfinite(float(loss_bf16)) and np.isfinite(float(loss_f32))
    # f32 kernel path must match the reference tightly; the bf16 MXU path is allowed the
    # usual bf16 input-rounding slack (accumulation is f32 either way).
    np.testing.assert_allclose(float(loss_f32), float(ref), rtol=2e-3, atol=2e-3)
    np.testing.assert_allclose(float(loss_bf16), float(ref), rtol=2e-2, atol=2e-2)

    print("KERNEL_OK")
</pallas_src>

<mosaic_0001>
module attributes {stable_mosaic.version = 11 : i64} {
  func.func @kernel(%arg0: i32, %arg1: memref<520x64xbf16, #tpu.memory_space<vmem>>, %arg2: memref<520x64xbf16, #tpu.memory_space<vmem>>, %arg3: memref<64x128xbf16, #tpu.memory_space<vmem>>, %arg4: memref<128x128xbf16, #tpu.memory_space<vmem>>, %arg5: memref<1x1x128xf32, #tpu.memory_space<vmem>>) attributes {dimension_semantics = [#tpu.dimension_semantics<parallel>], iteration_bounds = array<i64: 1>, scalar_prefetch = 0 : i64, scratch_operands = 0 : i64, tpu.core_type = #tpu.core_type<tc>, window_params = [{transform_indices = @transform_0, window_bounds = array<i64: 520, 64>}, {transform_indices = @transform_1, window_bounds = array<i64: 520, 64>}, {pipeline_mode = #tpu.pipeline_mode<synchronous>, transform_indices = @transform_2, window_bounds = array<i64: 64, 128>}, {pipeline_mode = #tpu.pipeline_mode<synchronous>, transform_indices = @transform_3, window_bounds = array<i64: 128, 128>}, {transform_indices = @transform_4, window_bounds = array<i64: 1, 1, 128>}]} {
    %c0 = arith.constant 0 : index
    %c0_0 = arith.constant 0 : index
    %0 = vector.load %arg3[%c0, %c0_0] : memref<64x128xbf16, #tpu.memory_space<vmem>>, vector<64x128xbf16>
    %c0_1 = arith.constant 0 : index
    %c0_2 = arith.constant 0 : index
    %1 = vector.load %arg4[%c0_1, %c0_2] : memref<128x128xbf16, #tpu.memory_space<vmem>>, vector<128x128xbf16>
    %c0_3 = arith.constant 0 : index
    %c0_4 = arith.constant 0 : index
    %2 = vector.load %arg1[%c0_3, %c0_4] : memref<520x64xbf16, #tpu.memory_space<vmem>>, vector<520x64xbf16>
    %cst = arith.constant dense<0.000000e+00> : vector<520x128xf32>
    %3 = tpu.matmul %2, %0, %cst {dimension_numbers = #tpu.dot_dimension_numbers<[1], [0], [0], [1], [0, 0, 1, 1], [], []>} : vector<520x64xbf16>, vector<64x128xbf16>, vector<520x128xf32> -> vector<520x128xf32>
    %c0_5 = arith.constant 0 : index
    %c0_6 = arith.constant 0 : index
    %4 = vector.load %arg2[%c0_5, %c0_6] : memref<520x64xbf16, #tpu.memory_space<vmem>>, vector<520x64xbf16>
    %cst_7 = arith.constant dense<0.000000e+00> : vector<520x128xf32>
    %5 = tpu.matmul %4, %0, %cst_7 {dimension_numbers = #tpu.dot_dimension_numbers<[1], [0], [0], [1], [0, 0, 1, 1], [], []>} : vector<520x64xbf16>, vector<64x128xbf16>, vector<520x128xf32> -> vector<520x128xf32>
    %6 = arith.mulf %3, %3 : vector<520x128xf32>
    %7 = arith.truncf %6 : vector<520x128xf32> to vector<520x128xbf16>
    %cst_8 = arith.constant dense<0.000000e+00> : vector<520x128xf32>
    %8 = tpu.matmul %7, %1, %cst_8 {dimension_numbers = #tpu.dot_dimension_numbers<[1], [0], [0], [1], [0, 0, 1, 1], [], []>} : vector<520x128xbf16>, vector<128x128xbf16>, vector<520x128xf32> -> vector<520x128xf32>
    %9 = arith.mulf %5, %5 : vector<520x128xf32>
    %10 = arith.truncf %9 : vector<520x128xf32> to vector<520x128xbf16>
    %cst_9 = arith.constant dense<0.000000e+00> : vector<520x128xf32>
    %11 = tpu.matmul %10, %1, %cst_9 {dimension_numbers = #tpu.dot_dimension_numbers<[1], [0], [0], [1], [0, 0, 1, 1], [], []>} : vector<520x128xbf16>, vector<128x128xbf16>, vector<520x128xf32> -> vector<520x128xf32>
    %12 = arith.subf %8, %11 : vector<520x128xf32>
    %13 = math.absf %12 : vector<520x128xf32>
    %14 = vector.shape_cast %13 : vector<520x128xf32> to vector<1x520x128xf32>
    %cst_10 = arith.constant dense<0.000000e+00> : vector<1xf32>
    %15 = vector.multi_reduction <add>, %14, %cst_10 [1, 2] : vector<1x520x128xf32> to vector<1xf32>
    %16 = vector.shape_cast %15 : vector<1xf32> to vector<1x1x1xf32>
    %17 = vector.extract %16[0, 0, 0] : f32 from vector<1x1x1xf32>
    %cst_11 = arith.constant 9.99999974E-6 : f32
    %18 = vector.broadcast %cst_11 : f32 to vector<520x128xf32>
    %19 = arith.addf %8, %18 : vector<520x128xf32>
    %cst_12 = arith.constant 9.99999974E-6 : f32
    %20 = vector.broadcast %cst_12 : f32 to vector<520x128xf32>
    %21 = arith.addf %11, %20 : vector<520x128xf32>
    %22 = arith.divf %19, %21 : vector<520x128xf32>
    %23 = math.log %22 : vector<520x128xf32>
    %24 = arith.mulf %23, %23 : vector<520x128xf32>
    %25 = vector.shape_cast %24 : vector<520x128xf32> to vector<1x520x128xf32>
    %cst_13 = arith.constant dense<0.000000e+00> : vector<1xf32>
    %26 = vector.multi_reduction <add>, %25, %cst_13 [1, 2] : vector<1x520x128xf32> to vector<1xf32>
    %27 = vector.shape_cast %26 : vector<1xf32> to vector<1x1x1xf32>
    %28 = vector.extract %27[0, 0, 0] : f32 from vector<1x1x1xf32>
    %cst_14 = arith.constant 5.65685415 : f32
    %29 = arith.mulf %cst_14, %28 : f32
    %30 = arith.addf %17, %29 : f32
    %31 = vector.broadcast %30 : f32 to vector<1x1x128xf32>
    %c0_15 = arith.constant 0 : index
    %c0_16 = arith.constant 0 : index
    %c0_17 = arith.constant 0 : index
    %32 = vector.load %arg5[%c0_15, %c0_16, %c0_17] : memref<1x1x128xf32, #tpu.memory_space<vmem>>, vector<1x1x128xf32>
    tpu.vector_store %arg5[%c0_15, %c0_16, %c0_17], %31 {strides = array<i32>} : memref<1x1x128xf32, #tpu.memory_space<vmem>>, vector<1x1x128xf32>,
    return
  }
  func.func @transform_0(%arg0: i32) -> (i32, i32) {
    %c0_i32 = arith.constant 0 : i32
    %c0_i32_0 = arith.constant 0 : i32
    return %arg0, %c0_i32 : i32, i32
  }
  func.func @transform_1(%arg0: i32) -> (i32, i32) {
    %c0_i32 = arith.constant 0 : i32
    %c0_i32_0 = arith.constant 0 : i32
    return %arg0, %c0_i32 : i32, i32
  }
  func.func @transform_2(%arg0: i32) -> (i32, i32) {
    %c0_i32 = arith.constant 0 : i32
    %c0_i32_0 = arith.constant 0 : i32
    %c0_i32_1 = arith.constant 0 : i32
    return %c0_i32, %c0_i32_0 : i32, i32
  }
  func.func @transform_3(%arg0: i32) -> (i32, i32) {
    %c0_i32 = arith.constant 0 : i32
    %c0_i32_0 = arith.constant 0 : i32
    %c0_i32_1 = arith.constant 0 : i32
    return %c0_i32, %c0_i32_0 : i32, i32
  }
  func.func @transform_4(%arg0: i32) -> (i32, i32, i32) {
    %c0_i32 = arith.constant 0 : i32
    %c0_i32_0 = arith.constant 0 : i32
    %c0_i32_1 = arith.constant 0 : i32
    return %arg0, %c0_i32, %c0_i32_0 : i32, i32, i32
  }
}

</mosaic_0001>

<bundles_post_ra>
// kernel: tpu_custom_call.1
= control target key start
LH: loop header
LB: loop body
LE: loop exit
PB: predicated region body
PF: predicated region fallthrough
CT: control target
= control target key end

     0   :  { %v4142_v1 = vmov 0.0   ;;  %vm4143_vm0 = vmmov 0   ;;  %vm295_vm1 = vcmask 523264   ;;  %s5627_s0 = inlined_call_operand.vmem [shape: bf16[520,64], index: 0, kind: input, shape index: {}]   ;;  %s5628_s1 = inlined_call_operand.vmem [shape: bf16[520,64], index: 1, kind: input, shape index: {}]   ;;  %s5629_s2 = inlined_call_operand.vmem [shape: bf16[64,128], index: 2, kind: input, shape index: {}]   ;;  %s5630_s3 = inlined_call_operand.vmem [shape: bf16[128,128], index: 3, kind: input, shape index: {}]   ;;  %s5631_s4 = inlined_call_operand.hbm [shape: f32[1,1,128], index: 4, kind: output, shape index: {}]  }
   0x1   :  { %v3782_v0 = vld [vmem:[%s5629_s2 + $0x18] sm:$0xff]   ;;  %3199 = vmatprep.subr.bf16.mxu0 %v4142_v1  ;;  %3339 = vmatprep.subr.bf16.mxu1 %v4142_v1  ;;  %v3783_v2 = vld [vmem:[%s5629_s2 + $0x10] sm:$0xff]   ;;  %v3784_v3 = vld [vmem:[%s5629_s2 + $0x8] sm:$0xff]  }
   0x2   :  { %3200 = vmatpush3.bf16.msra.mxu0 %v3782_v0  ;;  %3340 = vmatpush3.bf16.msra.mxu1 %v3782_v0  ;;  %v3785_v4 = vld [vmem:[%s5629_s2] sm:$0xff]   ;;  %v3788_v7 = vld [vmem:[%s5630_s3 + $0x38] sm:$0xff]   ;;  %v3797_v8 = vld [vmem:[%s5630_s3 + $0x30] sm:$0xff]  }
   0x3   :  { %3201 = vmatprep.subr.bf16.mxu0 %v4142_v1  ;;  %3341 = vmatprep.subr.bf16.mxu1 %v4142_v1  ;;  %v3786_v5 = vld [vmem:[%s5627_s0] sm:$0xff]   ;;  %v3789_v9 = vld [vmem:[%s5627_s0 + $0x8] sm:$0xff]   ;;  %v3791_v12 = vld [vmem:[%s5627_s0 + $0x10] sm:$0xff]  }
   0x4   :  { %3207 = vmatprep.mubr.msk.bf16.mxu0 %vm4143_vm0, %v4142_v1  ;;  %3347 = vmatprep.mubr.msk.bf16.mxu1 %vm4143_vm0, %v4142_v1  ;;  %v3787_v6 = vld [vmem:[%s5628_s1] sm:$0xff]   ;;  %v3790_v10 = vld [vmem:[%s5628_s1 + $0x8] sm:$0xff]   ;;  %v3792_v13 = vld [vmem:[%s5628_s1 + $0x10] sm:$0xff]  }
   0x5   :  { %v3806_v11 = vld [vmem:[%s5630_s3 + $0x28] sm:$0xff]   ;;  %v3815_v14 = vld [vmem:[%s5630_s3 + $0x20] sm:$0xff]   ;;  %v3793_v15 = vld [vmem:[%s5627_s0 + $0x18] sm:$0xff]  }
   0x6   :  { %3202 = vmatpush3.bf16.msra.mxu0 %v3783_v2  ;;  %3342 = vmatpush3.bf16.msra.mxu1 %v3783_v2  ;;  %v3794_v16 = vld [vmem:[%s5628_s1 + $0x18] sm:$0xff]   ;;  %v3795_v18 = vld [vmem:[%s5627_s0 + $0x20] sm:$0xff]   ;;  %v3798_v20 = vld [vmem:[%s5627_s0 + $0x28] sm:$0xff]  }
   0x7   :  { %3203 = vmatprep.subr.bf16.mxu0 %v4142_v1  ;;  %3343 = vmatprep.subr.bf16.mxu1 %v4142_v1  ;;  %v3824_v17 = vld [vmem:[%s5630_s3 + $0x18] sm:$0xff]   ;;  %v3796_v19 = vld [vmem:[%s5628_s1 + $0x20] sm:$0xff]   ;;  %v3833_v21 = vld [vmem:[%s5630_s3 + $0x10] sm:$0xff]  }
   0x8   :  { %v3799_v22 = vld [vmem:[%s5628_s1 + $0x28] sm:$0xff]   ;;  %v3800_v23 = vld [vmem:[%s5627_s0 + $0x30] sm:$0xff]   ;;  %v3802_v25 = vld [vmem:[%s5627_s0 + $0x38] sm:$0xff]  }
   0x9   :  { %v3801_v24 = vld [vmem:[%s5628_s1 + $0x30] sm:$0xff]   ;;  %v3803_v26 = vld [vmem:[%s5628_s1 + $0x38] sm:$0xff]  }
   0xa   :  { %3204 = vmatpush3.bf16.msra.mxu0 %v3784_v3  ;;  %3344 = vmatpush3.bf16.msra.mxu1 %v3784_v3 }
   0xb   :  { %3205 = vmatprep.subr.bf16.mxu0 %v4142_v1  ;;  %3345 = vmatprep.subr.bf16.mxu1 %v4142_v1 }
   0xe   :  { %3206 = vmatpush3.bf16.msra.mxu0 %v3785_v4  ;;  %3346 = vmatpush3.bf16.msra.mxu1 %v3785_v4 }
   0xf   :  { %3627 = vmatprep.subr.bf16.mxu1 %v4142_v1  ;;  %3479 = vmatprep.subr.bf16.mxu0 %v4142_v1 }
  0x11   :  { %3208 = vmatmul.mubr.msk.bf16.vlgmr.msra.gmra.mxu0 %vm295_vm1, %v3786_v5  ;;  %3348 = vmatmul.mubr.msk.bf16.vlgmr.msra.gmra.mxu1 %vm295_vm1, %v3787_v6 }
  0x12   :  { %3628 = vmatpush3.bf16.msra.mxu1 %v3788_v7  ;;  %3211 = vmatprep.mubr.msk.bf16.mxu0 %vm4143_vm0, %v4142_v1 }
  0x13   :  { %3351 = vmatprep.mubr.msk.bf16.mxu1 %vm4143_vm0, %v4142_v1  ;;  %3480 = vmatpush3.bf16.msra.mxu0 %v3788_v7 }
  0x14   :  { %3629 = vmatprep.subr.bf16.mxu1 %v4142_v1  ;;  %3481 = vmatprep.subr.bf16.mxu0 %v4142_v1 }
  0x16   :  { %3630 = vmatpush3.bf16.msra.mxu1 %v3797_v8 }
  0x17   :  { %3482 = vmatpush3.bf16.msra.mxu0 %v3797_v8  ;;  %3631 = vmatprep.subr.bf16.mxu1 %v4142_v1 }
  0x18   :  { %3483 = vmatprep.subr.bf16.mxu0 %v4142_v1 }
  0x19   :  { %3212 = vmatmul.mubr.msk.bf16.gmra.mxu0 %vm295_vm1, %v3789_v9  ;;  %3352 = vmatmul.mubr.msk.bf16.gmra.mxu1 %vm295_vm1, %v3790_v10 }
  0x1a   :  { %3215 = vmatprep.mubr.msk.bf16.mxu0 %vm4143_vm0, %v4142_v1  ;;  %3355 = vmatprep.mubr.msk.bf16.mxu1 %vm4143_vm0, %v4142_v1 }
  0x1b   :  { %3632 = vmatpush3.bf16.msra.mxu1 %v3806_v11  ;;  %3484 = vmatpush3.bf16.msra.mxu0 %v3806_v11 }
  0x1c   :  { %3633 = vmatprep.subr.bf16.mxu1 %v4142_v1  ;;  %3485 = vmatprep.subr.bf16.mxu0 %v4142_v1 }
  0x1f   :  { %3634 = vmatpush3.bf16.msra.mxu1 %v3815_v14  ;;  %3486 = vmatpush3.bf16.msra.mxu0 %v3815_v14 }
  0x20   :  { %3635 = vmatprep.subr.bf16.mxu1 %v4142_v1  ;;  %3487 = vmatprep.subr.bf16.mxu0 %v4142_v1 }
  0x21   :  { %3216 = vmatmul.mubr.msk.bf16.gmra.mxu0 %vm295_vm1, %v3791_v12  ;;  %3356 = vmatmul.mubr.msk.bf16.gmra.mxu1 %vm295_vm1, %v3792_v13 }
  0x22   :  { %3219 = vmatprep.mubr.msk.bf16.mxu0 %vm4143_vm0, %v4142_v1  ;;  %3359 = vmatprep.mubr.msk.bf16.mxu1 %vm4143_vm0, %v4142_v1 }
  0x23   :  { %3636 = vmatpush3.bf16.msra.mxu1 %v3824_v17  ;;  %3488 = vmatpush3.bf16.msra.mxu0 %v3824_v17 }
  0x24   :  { %3637 = vmatprep.subr.bf16.mxu1 %v4142_v1  ;;  %3489 = vmatprep.subr.bf16.mxu0 %v4142_v1 }
  0x27   :  { %3638 = vmatpush3.bf16.msra.mxu1 %v3833_v21  ;;  %3490 = vmatpush3.bf16.msra.mxu0 %v3833_v21 }
  0x28   :  { %3639 = vmatprep.subr.bf16.mxu1 %v4142_v1  ;;  %3491 = vmatprep.subr.bf16.mxu0 %v4142_v1 }
  0x29   :  { %3220 = vmatmul.mubr.msk.bf16.gmra.mxu0 %vm295_vm1, %v3793_v15  ;;  %3360 = vmatmul.mubr.msk.bf16.gmra.mxu1 %vm295_vm1, %v3794_v16 }
  0x2a   :  { %3223 = vmatprep.mubr.msk.bf16.mxu0 %vm4143_vm0, %v4142_v1  ;;  %3363 = vmatprep.mubr.msk.bf16.mxu1 %vm4143_vm0, %v4142_v1 }
  0x31   :  { %3224 = vmatmul.mubr.msk.bf16.gmra.mxu0 %vm295_vm1, %v3795_v18  ;;  %3364 = vmatmul.mubr.msk.bf16.gmra.mxu1 %vm295_vm1, %v3796_v19 }
  0x32   :  { %3227 = vmatprep.mubr.msk.bf16.mxu0 %vm4143_vm0, %v4142_v1  ;;  %3367 = vmatprep.mubr.msk.bf16.mxu1 %vm4143_vm0, %v4142_v1 }
  0x39   :  { %3228 = vmatmul.mubr.msk.bf16.gmra.mxu0 %vm295_vm1, %v3798_v20  ;;  %3368 = vmatmul.mubr.msk.bf16.gmra.mxu1 %vm295_vm1, %v3799_v22 }
  0x3a   :  { %3231 = vmatprep.mubr.msk.bf16.mxu0 %vm4143_vm0, %v4142_v1  ;;  %3371 = vmatprep.mubr.msk.bf16.mxu1 %vm4143_vm0, %v4142_v1 }
  0x41   :  { %3232 = vmatmul.mubr.msk.bf16.gmra.mxu0 %vm295_vm1, %v3800_v23  ;;  %3372 = vmatmul.mubr.msk.bf16.gmra.mxu1 %vm295_vm1, %v3801_v24 }
  0x42   :  { %3235 = vmatprep.mubr.msk.bf16.mxu0 %vm4143_vm0, %v4142_v1  ;;  %3375 = vmatprep.mubr.msk.bf16.mxu1 %vm4143_vm0, %v4142_v1 }
  0x43   :  { %9 = vsyncpa [#allocation3], 0  ;;  %v3804_v27 = vld [vmem:[%s5627_s0 + $0x40] sm:$0xff]   ;;  %v3807_v29 = vld [vmem:[%s5627_s0 + $0x48] sm:$0xff]   ;;  %s4144_s7 = smov [#allocation2]  }
  0x44   :  { %v3805_v28 = vld [vmem:[%s5628_s1 + $0x40] sm:$0xff]   ;;  %v3808_v30 = vld [vmem:[%s5628_s1 + $0x48] sm:$0xff]   ;;  %v3809_v32 = vld [vmem:[%s5627_s0 + $0x50] sm:$0xff]   ;;  %s2891_s8 = sshll.u32 %s4144_s7, 4  ;;  %s2892_s8 = int_to_ptr.vmem [resolvable:$true] %s2891_s8 }
  0x45   :  { %v3842_v31 = vld [vmem:[%s5630_s3 + $0x8] sm:$0xff]   ;;  %v3810_v33 = vld [vmem:[%s5628_s1 + $0x50] sm:$0xff]   ;;  %v3811_v34 = vld [vmem:[%s5627_s0 + $0x58] sm:$0xff]   ;;  %s4120_s10 = scalar_lea.vmem %s2892_s8, 16  ;;  %s4124_s11 = scalar_lea.vmem %s2892_s8, 32 }
  0x46   :  { %3640 = vmatpush3.bf16.msra.mxu1 %v3842_v31  ;;  %3492 = vmatpush3.bf16.msra.mxu0 %v3842_v31  ;;  %v3812_v35 = vld [vmem:[%s5628_s1 + $0x58] sm:$0xff]   ;;  %v3813_v36 = vld [vmem:[%s5627_s0 + $0x60] sm:$0xff]   ;;  %v3816_v38 = vld [vmem:[%s5627_s0 + $0x68] sm:$0xff]   ;;  %p4121_p0 = scmp.ne.s32.totalorder %s2892_s8, %s4120_s10  ;;  %p4125_p1 = scmp.lt.s32.totalorder %s2892_s8, %s2892_s8 }
  0x47   :  { %3641 = vmatprep.subr.bf16.mxu1 %v4142_v1  ;;  %3493 = vmatprep.subr.bf16.mxu0 %v4142_v1  ;;  %v3814_v37 = vld [vmem:[%s5628_s1 + $0x60] sm:$0xff]   ;;  %v3817_v39 = vld [vmem:[%s5628_s1 + $0x68] sm:$0xff]   ;;  %v3818_v41 = vld [vmem:[%s5627_s0 + $0x70] sm:$0xff]   ;;  %p4126_p2 = scmp.lt.s32.totalorder %s4124_s11, %s4120_s10 }
  0x48   :  { %v3853_v40 = vld [vmem:[%s5630_s3] sm:$0xff]   ;;  %v3819_v42 = vld [vmem:[%s5628_s1 + $0x70] sm:$0xff]   ;;  %v3820_v43 = vld [vmem:[%s5627_s0 + $0x78] sm:$0xff]  }
  0x49   :  { %3236 = vmatmul.mubr.msk.bf16.gmra.mxu0 %vm295_vm1, %v3802_v25  ;;  %3376 = vmatmul.mubr.msk.bf16.gmra.mxu1 %vm295_vm1, %v3803_v26  ;;  %v3821_v44 = vld [vmem:[%s5628_s1 + $0x78] sm:$0xff]   ;;  %v3822_v45 = vld [vmem:[%s5627_s0 + $0x80] sm:$0xff]   ;;  %v3825_v47 = vld [vmem:[%s5627_s0 + $0x88] sm:$0xff]   ;;  %p4127_p3 = por %p4126_p2, %p4125_p1 }
  0x4a   :  { %3239 = vmatprep.mubr.msk.bf16.mxu0 %vm4143_vm0, %v4142_v1  ;;  %3379 = vmatprep.mubr.msk.bf16.mxu1 %vm4143_vm0, %v4142_v1  ;;  %v3823_v46 = vld [vmem:[%s5628_s1 + $0x80] sm:$0xff]   ;;  %v3826_v48 = vld [vmem:[%s5628_s1 + $0x88] sm:$0xff]   ;;  %v3827_v49 = vld [vmem:[%s5627_s0 + $0x90] sm:$0xff]  }
  0x4b   :  { %3642 = vmatpush3.bf16.msra.mxu1 %v3853_v40  ;;  %3494 = vmatpush3.bf16.msra.mxu0 %v3853_v40  ;;  %v3828_v50 = vld [vmem:[%s5628_s1 + $0x90] sm:$0xff]   ;;  %v3829_v51 = vld [vmem:[%s5627_s0 + $0x98] sm:$0xff]   ;;  %v3831_v53 = vld [vmem:[%s5627_s0 + $0xa0] sm:$0xff]   ;;  %p4128_p4 = pnand %p4127_p3, %p4121_p0 }
  0x4c   :  { %v3830_v52 = vld [vmem:[%s5628_s1 + $0x98] sm:$0xff]   ;;  %v3832_v54 = vld [vmem:[%s5628_s1 + $0xa0] sm:$0xff]   ;;  %v3834_v55 = vld [vmem:[%s5627_s0 + $0xa8] sm:$0xff]  }
  0x4d   :  { %v3835_v56 = vld [vmem:[%s5628_s1 + $0xa8] sm:$0xff]   ;;  %v3836_v57 = vld [vmem:[%s5627_s0 + $0xb0] sm:$0xff]   ;;  %v3838_v59 = vld [vmem:[%s5627_s0 + $0xb8] sm:$0xff]  }
  0x4e   :  { %v3837_v58 = vld [vmem:[%s5628_s1 + $0xb0] sm:$0xff]   ;;  %v3839_v60 = vld [vmem:[%s5628_s1 + $0xb8] sm:$0xff]   ;;  %v3840_v61 = vld [vmem:[%s5627_s0 + $0xc0] sm:$0xff]  }
  0x4f   :  { %v3841_v62 = vld [vmem:[%s5628_s1 + $0xc0] sm:$0xff]   ;;  %v3843_v6 = vld [vmem:[%s5627_s0 + $0xc8] sm:$0xff]   ;;  %v3845_v16 = vld [vmem:[%s5627_s0 + $0xd0] sm:$0xff]  }
  0x50   :  { %v3844_v7 = vld [vmem:[%s5628_s1 + $0xc8] sm:$0xff]   ;;  %v3846_v17 = vld [vmem:[%s5628_s1 + $0xd0] sm:$0xff]   ;;  %v3847_v26 = vld [vmem:[%s5627_s0 + $0xd8] sm:$0xff]  }
  0x51   :  { %3240 = vmatmul.mubr.msk.bf16.gmra.mxu0 %vm295_vm1, %v3804_v27  ;;  %3380 = vmatmul.mubr.msk.bf16.gmra.mxu1 %vm295_vm1, %v3805_v28  ;;  %v3848_v27 = vld [vmem:[%s5628_s1 + $0xd8] sm:$0xff]  }
  0x52   :  { %3243 = vmatprep.mubr.msk.bf16.mxu0 %vm4143_vm0, %v4142_v1  ;;  %3383 = vmatprep.mubr.msk.bf16.mxu1 %vm4143_vm0, %v4142_v1 }
  0x59   :  { %3244 = vmatmul.mubr.msk.bf16.gmra.mxu0 %vm295_vm1, %v3807_v29  ;;  %3384 = vmatmul.mubr.msk.bf16.gmra.mxu1 %vm295_vm1, %v3808_v30 }
  0x5a   :  { %3247 = vmatprep.mubr.msk.bf16.mxu0 %vm4143_vm0, %v4142_v1  ;;  %3387 = vmatprep.mubr.msk.bf16.mxu1 %vm4143_vm0, %v4142_v1 }
  0x61   :  { %3248 = vmatmul.mubr.msk.bf16.gmra.mxu0 %vm295_vm1, %v3809_v32  ;;  %3388 = vmatmul.mubr.msk.bf16.gmra.mxu1 %vm295_vm1, %v3810_v33 }
  0x62   :  { %3251 = vmatprep.mubr.msk.bf16.mxu0 %vm4143_vm0, %v4142_v1  ;;  %3391 = vmatprep.mubr.msk.bf16.mxu1 %vm4143_vm0, %v4142_v1 }
  0x69   :  { %3252 = vmatmul.mubr.msk.bf16.gmra.mxu0 %vm295_vm1, %v3811_v34  ;;  %3392 = vmatmul.mubr.msk.bf16.gmra.mxu1 %vm295_vm1, %v3812_v35 }
  0x6a   :  { %3255 = vmatprep.mubr.msk.bf16.mxu0 %vm4143_vm0, %v4142_v1  ;;  %3395 = vmatprep.mubr.msk.bf16.mxu1 %vm4143_vm0, %v4142_v1 }
  0x71   :  { %3256 = vmatmul.mubr.msk.bf16.gmra.mxu0 %vm295_vm1, %v3813_v36  ;;  %3396 = vmatmul.mubr.msk.bf16.gmra.mxu1 %vm295_vm1, %v3814_v37  ;;  %v3849_v36 = vld [vmem:[%s5627_s0 + $0xe0] sm:$0xff]  }
  0x72   :  { %3259 = vmatprep.mubr.msk.bf16.mxu0 %vm4143_vm0, %v4142_v1  ;;  %3399 = vmatprep.mubr.msk.bf16.mxu1 %vm4143_vm0, %v4142_v1  ;;  %v3850_v37 = vld [vmem:[%s5628_s1 + $0xe0] sm:$0xff]  }
  0x79   :  { %3260 = vmatmul.mubr.msk.bf16.gmra.mxu0 %vm295_vm1, %v3816_v38  ;;  %3400 = vmatmul.mubr.msk.bf16.gmra.mxu1 %vm295_vm1, %v3817_v39 }
  0x7a   :  { %3263 = vmatprep.mubr.msk.bf16.mxu0 %vm4143_vm0, %v4142_v1  ;;  %3403 = vmatprep.mubr.msk.bf16.mxu1 %vm4143_vm0, %v4142_v1 }
  0x81   :  { %3264 = vmatmul.mubr.msk.bf16.gmra.mxu0 %vm295_vm1, %v3818_v41  ;;  %3404 = vmatmul.mubr.msk.bf16.gmra.mxu1 %vm295_vm1, %v3819_v42 }
  0x82   :  { %3267 = vmatprep.mubr.msk.bf16.mxu0 %vm4143_vm0, %v4142_v1  ;;  %3407 = vmatprep.mubr.msk.bf16.mxu1 %vm4143_vm0, %v4142_v1 }
  0x89   :  { %3268 = vmatmul.mubr.msk.bf16.gmra.mxu0 %vm295_vm1, %v3820_v43  ;;  %3408 = vmatmul.mubr.msk.bf16.gmra.mxu1 %vm295_vm1, %v3821_v44 }
  0x8a   :  { %3271 = vmatprep.mubr.msk.bf16.mxu0 %vm4143_vm0, %v4142_v1  ;;  %3411 = vmatprep.mubr.msk.bf16.mxu1 %vm4143_vm0, %v4142_v1 }
  0x91   :  { %3272 = vmatmul.mubr.msk.bf16.gmra.mxu0 %vm295_vm1, %v3822_v45  ;;  %3412 = vmatmul.mubr.msk.bf16.gmra.mxu1 %vm295_vm1, %v3823_v46  ;;  %v3851_v46 = vld [vmem:[%s5627_s0 + $0xe8] sm:$0xff]  }
  0x92   :  { %3275 = vmatprep.mubr.msk.bf16.mxu0 %vm4143_vm0, %v4142_v1  ;;  %3415 = vmatprep.mubr.msk.bf16.mxu1 %vm4143_vm0, %v4142_v1 }
  0x99   :  { %3276 = vmatmul.mubr.msk.bf16.gmra.mxu0 %vm295_vm1, %v3825_v47  ;;  %3416 = vmatmul.mubr.msk.bf16.gmra.mxu1 %vm295_vm1, %v3826_v48  ;;  %v3852_v47 = vld [vmem:[%s5628_s1 + $0xe8] sm:$0xff]  }
  0x9a   :  { %3279 = vmatprep.mubr.msk.bf16.mxu0 %vm4143_vm0, %v4142_v1  ;;  %3419 = vmatprep.mubr.msk.bf16.mxu1 %vm4143_vm0, %v4142_v1 }
  0xa1   :  { %3280 = vmatmul.mubr.msk.bf16.gmra.mxu0 %vm295_vm1, %v3827_v49  ;;  %3420 = vmatmul.mubr.msk.bf16.gmra.mxu1 %vm295_vm1, %v3828_v50 }
  0xa2   :  { %3283 = vmatprep.mubr.msk.bf16.mxu0 %vm4143_vm0, %v4142_v1  ;;  %3423 = vmatprep.mubr.msk.bf16.mxu1 %vm4143_vm0, %v4142_v1 }
  0xa9   :  { %3284 = vmatmul.mubr.msk.bf16.gmra.mxu0 %vm295_vm1, %v3829_v51  ;;  %3424 = vmatmul.mubr.msk.bf16.gmra.mxu1 %vm295_vm1, %v3830_v52 }
  0xaa   :  { %3287 = vmatprep.mubr.msk.bf16.mxu0 %vm4143_vm0, %v4142_v1  ;;  %3427 = vmatprep.mubr.msk.bf16.mxu1 %vm4143_vm0, %v4142_v1 }
  0xb1   :  { %3288 = vmatmul.mubr.msk.bf16.gmra.mxu0 %vm295_vm1, %v3831_v53  ;;  %3428 = vmatmul.mubr.msk.bf16.gmra.mxu1 %vm295_vm1, %v3832_v54 }
  0xb2   :  { %3291 = vmatprep.mubr.msk.bf16.mxu0 %vm4143_vm0, %v4142_v1  ;;  %3431 = vmatprep.mubr.msk.bf16.mxu1 %vm4143_vm0, %v4142_v1 }
  0xb9   :  { %3292 = vmatmul.mubr.msk.bf16.gmra.mxu0 %vm295_vm1, %v3834_v55  ;;  %3432 = vmatmul.mubr.msk.bf16.gmra.mxu1 %vm295_vm1, %v3835_v56  ;;  %v3854_v56 = vld [vmem:[%s5627_s0 + $0xf0] sm:$0xff]  }
  0xba   :  { %3295 = vmatprep.mubr.msk.bf16.mxu0 %vm4143_vm0, %v4142_v1  ;;  %3435 = vmatprep.mubr.msk.bf16.mxu1 %vm4143_vm0, %v4142_v1 }
  0xc1   :  { %3296 = vmatmul.mubr.msk.bf16.gmra.mxu0 %vm295_vm1, %v3836_v57  ;;  %3436 = vmatmul.mubr.msk.bf16.gmra.mxu1 %vm295_vm1, %v3837_v58  ;;  %v3855_v57 = vld [vmem:[%s5628_s1 + $0xf0] sm:$0xff]  }
  0xc2   :  { %3299 = vmatprep.mubr.msk.bf16.mxu0 %vm4143_vm0, %v4142_v1  ;;  %3439 = vmatprep.mubr.msk.bf16.mxu1 %vm4143_vm0, %v4142_v1 }
  0xc9   :  { %3300 = vmatmul.mubr.msk.bf16.gmra.mxu0 %vm295_vm1, %v3838_v59  ;;  %3440 = vmatmul.mubr.msk.bf16.gmra.mxu1 %vm295_vm1, %v3839_v60 }
  0xca   :  { %3303 = vmatprep.mubr.msk.bf16.mxu0 %vm4143_vm0, %v4142_v1  ;;  %3443 = vmatprep.mubr.msk.bf16.mxu1 %vm4143_vm0, %v4142_v1 }
  0xd1   :  { %v4528_v63 = vpop.f32.mrf.mxu0  ;;  %3304 = vmatmul.mubr.msk.bf16.gmra.mxu0 %vm295_vm1, %v3840_v61  ;;  %v4531_v0 = vpop.f32.mrf.mxu1  ;;  %3444 = vmatmul.mubr.msk.bf16.gmra.mxu1 %vm295_vm1, %v3841_v62 }
  0xd2   :  { %3307 = vmatprep.mubr.msk.bf16.mxu0 %vm4143_vm0, %v4142_v1  ;;  %3447 = vmatprep.mubr.msk.bf16.mxu1 %vm4143_vm0, %v4142_v1 }
  0xd3   :  { %v3209_v2 = vpop.f32.mrf.mxu0  ;;  %v3349_v3 = vpop.f32.mrf.mxu1 }
  0xd5   :  { %v4538_v4 = vpop.f32.mrf.mxu0  ;;  %v4540_v5 = vpop.f32.mrf.mxu1 }
  0xd7   :  { %v3210_v8 = vpop.f32.mrf.mxu0  ;;  %v3350_v9 = vpop.f32.mrf.mxu1 }
  0xd8   :  { %v3857_v8 = vld [vmem:[%s5628_s1 + $0xf8] sm:$0xff]  }
  0xd9   :  { %v4548_v10 = vpop.f32.mrf.mxu0  ;;  %3308 = vmatmul.mubr.msk.bf16.gmra.mxu0 %vm295_vm1, %v3843_v6  ;;  %v4551_v11 = vpop.f32.mrf.mxu1  ;;  %3448 = vmatmul.mubr.msk.bf16.gmra.mxu1 %vm295_vm1, %v3844_v7  ;;  %v3856_v7 = vld [vmem:[%s5627_s0 + $0xf8] sm:$0xff]  }
  0xda   :  { %3311 = vmatprep.mubr.msk.bf16.mxu0 %vm4143_vm0, %v4142_v1  ;;  %3451 = vmatprep.mubr.msk.bf16.mxu1 %vm4143_vm0, %v4142_v1 }
  0xdb   :  { %v3213_v12 = vpop.f32.mrf.mxu0  ;;  %v3353_v13 = vpop.f32.mrf.mxu1 }
  0xdd   :  { %v4558_v14 = vpop.f32.mrf.mxu0  ;;  %v4560_v15 = vpop.f32.mrf.mxu1 }
  0xdf   :  { %v3214_v18 = vpop.f32.mrf.mxu0  ;;  %v3354_v19 = vpop.f32.mrf.mxu1 }
  0xe1   :  { %v4568_v20 = vpop.f32.mrf.mxu0  ;;  %3312 = vmatmul.mubr.msk.bf16.gmra.mxu0 %vm295_vm1, %v3845_v16  ;;  %v4571_v21 = vpop.f32.mrf.mxu1  ;;  %3452 = vmatmul.mubr.msk.bf16.gmra.mxu1 %vm295_vm1, %v3846_v17 }
  0xe2   :  { %3315 = vmatprep.mubr.msk.bf16.mxu0 %vm4143_vm0, %v4142_v1  ;;  %3455 = vmatprep.mubr.msk.bf16.mxu1 %vm4143_vm0, %v4142_v1 }
  0xe3   :  { %v3217_v22 = vpop.f32.mrf.mxu0  ;;  %v3357_v23 = vpop.f32.mrf.mxu1 }
  0xe4   :  { %v3858_v23 = vld [vmem:[%s5627_s0 + $0x100] ss:$0 sps:$4 sm:$0xff]  }
  0xe5   :  { %v4578_v24 = vpop.f32.mrf.mxu0  ;;  %v4580_v25 = vpop.f32.mrf.mxu1 }
  0xe7   :  { %v3218_v28 = vpop.f32.mrf.mxu0  ;;  %v3358_v29 = vpop.f32.mrf.mxu1 }
  0xe9   :  { %v4588_v30 = vpop.f32.mrf.mxu0  ;;  %3316 = vmatmul.mubr.msk.bf16.gmra.mxu0 %vm295_vm1, %v3847_v26  ;;  %v4591_v31 = vpop.f32.mrf.mxu1  ;;  %3456 = vmatmul.mubr.msk.bf16.gmra.mxu1 %vm295_vm1, %v3848_v27  ;;  %v3859_v26 = vld [vmem:[%s5628_s1 + $0x100] ss:$0 sps:$4 sm:$0xff]  }
  0xea   :  { %3319 = vmatprep.mubr.msk.bf16.mxu0 %vm4143_vm0, %v4142_v1  ;;  %3459 = vmatprep.mubr.msk.bf16.mxu1 %vm4143_vm0, %v4142_v1 }
  0xeb   :  { %v3221_v32 = vpop.f32.mrf.mxu0  ;;  %v3361_v33 = vpop.f32.mrf.mxu1 }
  0xec   :  { %v1314_v33 = vmul.f32 %v4528_v63, %v4528_v63 }
  0xed   :  { %v4598_v34 = vpop.f32.mrf.mxu0  ;;  %v4600_v35 = vpop.f32.mrf.mxu1 }
  0xef   :  { %v3222_v38 = vpop.f32.mrf.mxu0  ;;  %v3362_v39 = vpop.f32.mrf.mxu1 }
  0xf1   :  { %v4608_v40 = vpop.f32.mrf.mxu0  ;;  %3320 = vmatmul.mubr.msk.bf16.gmra.mxu0 %vm295_vm1, %v3849_v36  ;;  %v4611_v41 = vpop.f32.mrf.mxu1  ;;  %3460 = vmatmul.mubr.msk.bf16.gmra.mxu1 %vm295_vm1, %v3850_v37  ;;  %v1315_v36 = vmul.f32 %v4538_v4, %v4538_v4  ;;  %v1757_v37 = vmul.f32 %v4540_v5, %v4540_v5  ;;  %v1317_v4 = vmul.f32 %v4558_v14, %v4558_v14 }
  0xf2   :  { %3323 = vmatprep.mubr.msk.bf16.mxu0 %vm4143_vm0, %v4142_v1  ;;  %3463 = vmatprep.mubr.msk.bf16.mxu1 %vm4143_vm0, %v4142_v1  ;;  %v1759_v5 = vmul.f32 %v4560_v15, %v4560_v15  ;;  %v1319_v14 = vmul.f32 %v4578_v24, %v4578_v24  ;;  %v1761_v15 = vmul.f32 %v4580_v25, %v4580_v25 }
  0xf3   :  { %v3225_v42 = vpop.f32.mrf.mxu0  ;;  %v3365_v43 = vpop.f32.mrf.mxu1  ;;  %v1321_v24 = vmul.f32 %v4598_v34, %v4598_v34  ;;  %v1763_v25 = vmul.f32 %v4600_v35, %v4600_v35 }
  0xf4   :  { %v1756_v42 = vmul.f32 %v4531_v0, %v4531_v0  ;;  %v1316_v0 = vmul.f32 %v4548_v10, %v4548_v10 }
  0xf5   :  { %v4618_v44 = vpop.f32.mrf.mxu0  ;;  %v4620_v45 = vpop.f32.mrf.mxu1 }
  0xf6   :  { %v1323_v34 = vmul.f32 %v4618_v44, %v4618_v44  ;;  %v1765_v35 = vmul.f32 %v4620_v45, %v4620_v45 }
  0xf7   :  { %v3226_v48 = vpop.f32.mrf.mxu0  ;;  %v3366_v49 = vpop.f32.mrf.mxu1 }
  0xf8   :  { %v1821_v48 = vpack.c.bf16 %v1757_v37, %v1756_v42 }
  0xf9   :  { %v4628_v50 = vpop.f32.mrf.mxu0  ;;  %3324 = vmatmul.mubr.msk.bf16.gmra.mxu0 %vm295_vm1, %v3851_v46  ;;  %v4631_v51 = vpop.f32.mrf.mxu1  ;;  %3464 = vmatmul.mubr.msk.bf16.gmra.mxu1 %vm295_vm1, %v3852_v47  ;;  %v1379_v47 = vpack.c.bf16 %v1315_v36, %v1314_v33 }
  0xfa   :  { %3327 = vmatprep.mubr.msk.bf16.mxu0 %vm4143_vm0, %v4142_v1  ;;  %3467 = vmatprep.mubr.msk.bf16.mxu1 %vm4143_vm0, %v4142_v1 }
  0xfb   :  { %v3229_v52 = vpop.f32.mrf.mxu0  ;;  %v3369_v53 = vpop.f32.mrf.mxu1 }
  0xfd   :  { %v4638_v54 = vpop.f32.mrf.mxu0  ;;  %v4640_v55 = vpop.f32.mrf.mxu1 }
  0xfe   :  { %v1325_v44 = vmul.f32 %v4638_v54, %v4638_v54  ;;  %v1767_v45 = vmul.f32 %v4640_v55, %v4640_v55 }
  0xff   :  { %v3230_v58 = vpop.f32.mrf.mxu0  ;;  %v3370_v59 = vpop.f32.mrf.mxu1 }
 0x100   :  { %v1758_v58 = vmul.f32 %v4551_v11, %v4551_v11  ;;  %v1318_v11 = vmul.f32 %v4568_v20, %v4568_v20 }
 0x101   :  { %v4648_v60 = vpop.f32.mrf.mxu0  ;;  %3328 = vmatmul.mubr.msk.bf16.gmra.mxu0 %vm295_vm1, %v3854_v56  ;;  %v4651_v61 = vpop.f32.mrf.mxu1  ;;  %3468 = vmatmul.mubr.msk.bf16.gmra.mxu1 %vm295_vm1, %v3855_v57 }
 0x102   :  { %3331 = vmatprep.mubr.msk.bf16.mxu0 %vm4143_vm0, %v4142_v1  ;;  %3471 = vmatprep.mubr.msk.bf16.mxu1 %vm4143_vm0, %v4142_v1 }
 0x103   :  { %v3233_v62 = vpop.f32.mrf.mxu0  ;;  %v3373_v2 = vpop.f32.mrf.mxu1 }
 0x104   :  { %v1380_v2 = vpack.c.bf16 %v1317_v4, %v1316_v0 }
 0x105   :  { %v4658_v3 = vpop.f32.mrf.mxu0  ;;  %v4660_v6 = vpop.f32.mrf.mxu1 }
 0x106   :  { %v1327_v54 = vmul.f32 %v4658_v3, %v4658_v3  ;;  %v1769_v55 = vmul.f32 %v4660_v6, %v4660_v6 }
 0x107   :  { %v3234_v9 = vpop.f32.mrf.mxu0  ;;  %v3374_v12 = vpop.f32.mrf.mxu1 }
 0x109   :  { %v4668_v13 = vpop.f32.mrf.mxu0  ;;  %3332 = vmatmul.mubr.msk.bf16.gmra.mxu0 %vm295_vm1, %v3856_v7  ;;  %v4671_v16 = vpop.f32.mrf.mxu1  ;;  %3472 = vmatmul.mubr.msk.bf16.gmra.mxu1 %vm295_vm1, %v3857_v8  ;;  %v1822_v7 = vpack.c.bf16 %v1759_v5, %v1758_v58 }
 0x10a   :  { %3335 = vmatprep.mubr.msk.bf16.mxu0 %vm4143_vm0, %v4142_v1  ;;  %3475 = vmatprep.mubr.msk.bf16.mxu1 %vm4143_vm0, %v4142_v1 }
 0x10b   :  { %v3237_v17 = vpop.f32.mrf.mxu0  ;;  %v3377_v18 = vpop.f32.mrf.mxu1 }
 0x10d   :  { %v4678_v19 = vpop.f32.mrf.mxu0  ;;  %v4680_v22 = vpop.f32.mrf.mxu1 }
 0x10e   :  { %v1329_v3 = vmul.f32 %v4678_v19, %v4678_v19  ;;  %v1771_v6 = vmul.f32 %v4680_v22, %v4680_v22 }
 0x10f   :  { %v3238_v27 = vpop.f32.mrf.mxu0  ;;  %v3378_v28 = vpop.f32.mrf.mxu1 }
 0x110   :  { %v1381_v28 = vpack.c.bf16 %v1319_v14, %v1318_v11 }
 0x111   :  { %v4688_v29 = vpop.f32.mrf.mxu0  ;;  %3336 = vmatmul.mubr.msk.bf16.gmra.mxu0 %vm295_vm1, %v3858_v23  ;;  %v4691_v32 = vpop.f32.mrf.mxu1  ;;  %3476 = vmatmul.mubr.msk.bf16.gmra.mxu1 %vm295_vm1, %v3859_v26  ;;  %v1760_v23 = vmul.f32 %v4571_v21, %v4571_v21  ;;  %v1320_v21 = vmul.f32 %v4588_v30, %v4588_v30 }
 0x112   :  { %3495 = vmatprep.mubr.msk.bf16.mxu0 %vm4143_vm0, %v4142_v1  ;;  %3643 = vmatprep.mubr.msk.bf16.mxu1 %vm4143_vm0, %v4142_v1 }
 0x113   :  { %v3241_v38 = vpop.f32.mrf.mxu0  ;;  %v3381_v39 = vpop.f32.mrf.mxu1  ;;  %v1823_v33 = vpack.c.bf16 %v1761_v15, %v1760_v23 }
 0x115   :  { %v4706_v43 = vpop.f32.mrf.mxu0  ;;  %v4708_v46 = vpop.f32.mrf.mxu1 }
 0x116   :  { %v1331_v19 = vmul.f32 %v4706_v43, %v4706_v43  ;;  %v1773_v22 = vmul.f32 %v4708_v46, %v4708_v46 }
 0x117   :  { %v3242_v49 = vpop.f32.mrf.mxu0  ;;  %v3382_v52 = vpop.f32.mrf.mxu1 }
 0x118   :  { %v1382_v52 = vpack.c.bf16 %v1321_v24, %v1320_v21 }
 0x119   :  { %v4710_v63 = vpop.f32.mrf.mxu0  ;;  %v4712_v53 = vpop.f32.mrf.mxu1  ;;  %3496 = vmatmul.mubr.bf16.vlgmr.msra.gmra.mxu0 %v1379_v47  ;;  %3644 = vmatmul.mubr.bf16.vlgmr.msra.gmra.mxu1 %v1821_v48  ;;  %v1762_v47 = vmul.f32 %v4591_v31, %v4591_v31  ;;  %v1322_v31 = vmul.f32 %v4608_v40, %v4608_v40 }
 0x11a   :  { %3499 = vmatprep.mubr.msk.bf16.mxu0 %vm4143_vm0, %v4142_v1  ;;  %3647 = vmatprep.mubr.msk.bf16.mxu1 %vm4143_vm0, %v4142_v1 }
 0x11b   :  { %v3245_v56 = vpop.f32.mrf.mxu0  ;;  %v3385_v57 = vpop.f32.mrf.mxu1  ;;  %v1824_v0 = vpack.c.bf16 %v1763_v25, %v1762_v47 }
 0x11d   :  { %v4726_v59 = vpop.f32.mrf.mxu0  ;;  %v4728_v62 = vpop.f32.mrf.mxu1 }
 0x11e   :  { %v1333_v43 = vmul.f32 %v4726_v59, %v4726_v59  ;;  %v1775_v46 = vmul.f32 %v4728_v62, %v4728_v62 }
 0x11f   :  { %v3246_v8 = vpop.f32.mrf.mxu0  ;;  %v3386_v9 = vpop.f32.mrf.mxu1 }
 0x120   :  { %v1383_v9 = vpack.c.bf16 %v1323_v34, %v1322_v31 }
 0x121   :  { %v4730_v10 = vpop.f32.mrf.mxu0  ;;  %v4732_v12 = vpop.f32.mrf.mxu1  ;;  %3500 = vmatmul.mubr.bf16.gmra.mxu0 %v1380_v2  ;;  %3648 = vmatmul.mubr.bf16.gmra.mxu1 %v1822_v7  ;;  %v1764_v2 = vmul.f32 %v4611_v41, %v4611_v41  ;;  %v1324_v41 = vmul.f32 %v4628_v50, %v4628_v50 }
 0x122   :  { %3503 = vmatprep.mubr.msk.bf16.mxu0 %vm4143_vm0, %v4142_v1  ;;  %3651 = vmatprep.mubr.msk.bf16.mxu1 %vm4143_vm0, %v4142_v1 }
 0x123   :  { %v3249_v17 = vpop.f32.mrf.mxu0  ;;  %v3389_v18 = vpop.f32.mrf.mxu1  ;;  %v1825_v11 = vpack.c.bf16 %v1765_v35, %v1764_v2 }
 0x125   :  { %v4746_v26 = vpop.f32.mrf.mxu0  ;;  %v4748_v27 = vpop.f32.mrf.mxu1 }
 0x126   :  { %v1335_v59 = vmul.f32 %v4746_v26, %v4746_v26  ;;  %v1777_v62 = vmul.f32 %v4748_v27, %v4748_v27 }
 0x127   :  { %v3250_v36 = vpop.f32.mrf.mxu0  ;;  %v3390_v37 = vpop.f32.mrf.mxu1 }
 0x128   :  { %v1384_v37 = vpack.c.bf16 %v1325_v44, %v1324_v41 }
 0x129   :  { %v4750_v20 = vpop.f32.mrf.mxu0  ;;  %v4752_v38 = vpop.f32.mrf.mxu1  ;;  %3504 = vmatmul.mubr.bf16.gmra.mxu0 %v1381_v28  ;;  %3652 = vmatmul.mubr.bf16.gmra.mxu1 %v1823_v33  ;;  %v1766_v28 = vmul.f32 %v4631_v51, %v4631_v51  ;;  %v1326_v51 = vmul.f32 %v4648_v60, %v4648_v60 }
 0x12a   :  { %3507 = vmatprep.mubr.msk.bf16.mxu0 %vm4143_vm0, %v4142_v1  ;;  %3655 = vmatprep.mubr.msk.bf16.mxu1 %vm4143_vm0, %v4142_v1 }
 0x12b   :  { %v3253_v39 = vpop.f32.mrf.mxu0  ;;  %v3393_v42 = vpop.f32.mrf.mxu1  ;;  %v1826_v21 = vpack.c.bf16 %v1767_v45, %v1766_v28 }
 0x12d   :  { %v4766_v48 = vpop.f32.mrf.mxu0  ;;  %v4768_v49 = vpop.f32.mrf.mxu1 }
 0x12e   :  { %v1337_v26 = vmul.f32 %v4766_v48, %v4766_v48  ;;  %v1779_v27 = vmul.f32 %v4768_v49, %v4768_v49 }
 0x12f   :  { %v3254_v4 = vpop.f32.mrf.mxu0  ;;  %v3394_v5 = vpop.f32.mrf.mxu1 }
 0x130   :  { %v1385_v5 = vpack.c.bf16 %v1327_v54, %v1326_v51 }
 0x131   :  { %v4770_v30 = vpop.f32.mrf.mxu0  ;;  %v4772_v56 = vpop.f32.mrf.mxu1  ;;  %3508 = vmatmul.mubr.bf16.gmra.mxu0 %v1382_v52  ;;  %3656 = vmatmul.mubr.bf16.gmra.mxu1 %v1824_v0  ;;  %v1768_v52 = vmul.f32 %v4651_v61, %v4651_v61  ;;  %v1328_v61 = vmul.f32 %v4668_v13, %v4668_v13 }
 0x132   :  { %3511 = vmatprep.mubr.msk.bf16.mxu0 %vm4143_vm0, %v4142_v1  ;;  %3659 = vmatprep.mubr.msk.bf16.mxu1 %vm4143_vm0, %v4142_v1 }
 0x133   :  { %v3257_v57 = vpop.f32.mrf.mxu0  ;;  %v3397_v58 = vpop.f32.mrf.mxu1  ;;  %v1827_v31 = vpack.c.bf16 %v1769_v55, %v1768_v52 }
 0x135   :  { %v4786_v7 = vpop.f32.mrf.mxu0  ;;  %v4788_v8 = vpop.f32.mrf.mxu1 }
 0x136   :  { %v1339_v48 = vmul.f32 %v4786_v7, %v4786_v7  ;;  %v1781_v49 = vmul.f32 %v4788_v8, %v4788_v8 }
 0x137   :  { %v3258_v14 = vpop.f32.mrf.mxu0  ;;  %v3398_v15 = vpop.f32.mrf.mxu1 }
 0x138   :  { %v1386_v15 = vpack.c.bf16 %v1329_v3, %v1328_v61 }
 0x139   :  { %v4790_v40 = vpop.f32.mrf.mxu0  ;;  %v4792_v17 = vpop.f32.mrf.mxu1  ;;  %3512 = vmatmul.mubr.bf16.gmra.mxu0 %v1383_v9  ;;  %3660 = vmatmul.mubr.bf16.gmra.mxu1 %v1825_v11  ;;  %v1770_v9 = vmul.f32 %v4671_v16, %v4671_v16  ;;  %v1330_v16 = vmul.f32 %v4688_v29, %v4688_v29 }
 0x13a   :  { %3515 = vmatprep.mubr.msk.bf16.mxu0 %vm4143_vm0, %v4142_v1  ;;  %3663 = vmatprep.mubr.msk.bf16.mxu1 %vm4143_vm0, %v4142_v1 }
 0x13b   :  { %v3261_v18 = vpop.f32.mrf.mxu0  ;;  %v3401_v23 = vpop.f32.mrf.mxu1  ;;  %v1828_v41 = vpack.c.bf16 %v1771_v6, %v1770_v9 }
 0x13d   :  { %v4806_v33 = vpop.f32.mrf.mxu0  ;;  %v4808_v36 = vpop.f32.mrf.mxu1 }
 0x13e   :  { %v1341_v7 = vmul.f32 %v4806_v33, %v4806_v33  ;;  %v1783_v8 = vmul.f32 %v4808_v36, %v4808_v36 }
 0x13f   :  { %v3262_v24 = vpop.f32.mrf.mxu0  ;;  %v3402_v25 = vpop.f32.mrf.mxu1 }
 0x140   :  { %v1387_v25 = vpack.c.bf16 %v1331_v19, %v1330_v16 }
 0x141   :  { %v4810_v50 = vpop.f32.mrf.mxu0  ;;  %v4812_v39 = vpop.f32.mrf.mxu1  ;;  %3516 = vmatmul.mubr.bf16.gmra.mxu0 %v1384_v37  ;;  %3664 = vmatmul.mubr.bf16.gmra.mxu1 %v1826_v21  ;;  %v1772_v37 = vmul.f32 %v4691_v32, %v4691_v32  ;;  %v1332_v32 = vmul.f32 %v4710_v63, %v4710_v63 }
 0x142   :  { %3519 = vmatprep.mubr.msk.bf16.mxu0 %vm4143_vm0, %v4142_v1  ;;  %3667 = vmatprep.mubr.msk.bf16.mxu1 %vm4143_vm0, %v4142_v1 }
 0x143   :  { %v3265_v42 = vpop.f32.mrf.mxu0  ;;  %v3405_v47 = vpop.f32.mrf.mxu1  ;;  %v1829_v51 = vpack.c.bf16 %v1773_v22, %v1772_v37 }
 0x145   :  { %v4826_v0 = vpop.f32.mrf.mxu0  ;;  %v4828_v4 = vpop.f32.mrf.mxu1 }
 0x146   :  { %v1343_v33 = vmul.f32 %v4826_v0, %v4826_v0  ;;  %v1785_v36 = vmul.f32 %v4828_v4, %v4828_v4 }
 0x147   :  { %v3266_v34 = vpop.f32.mrf.mxu0  ;;  %v3406_v35 = vpop.f32.mrf.mxu1 }
 0x148   :  { %v1388_v35 = vpack.c.bf16 %v1333_v43, %v1332_v32 }
 0x149   :  { %v4830_v60 = vpop.f32.mrf.mxu0  ;;  %v4832_v57 = vpop.f32.mrf.mxu1  ;;  %3520 = vmatmul.mubr.bf16.gmra.mxu0 %v1385_v5  ;;  %3668 = vmatmul.mubr.bf16.gmra.mxu1 %v1827_v31  ;;  %v1774_v5 = vmul.f32 %v4712_v53, %v4712_v53  ;;  %v1334_v53 = vmul.f32 %v4730_v10, %v4730_v10 }
 0x14a   :  { %3523 = vmatprep.mubr.msk.bf16.mxu0 %vm4143_vm0, %v4142_v1  ;;  %3671 = vmatprep.mubr.msk.bf16.mxu1 %vm4143_vm0, %v4142_v1 }
 0x14b   :  { %v3269_v58 = vpop.f32.mrf.mxu0  ;;  %v3409_v2 = vpop.f32.mrf.mxu1  ;;  %v1830_v61 = vpack.c.bf16 %v1775_v46, %v1774_v5 }
 0x14d   :  { %v4846_v11 = vpop.f32.mrf.mxu0  ;;  %v4848_v14 = vpop.f32.mrf.mxu1 }
 0x14e   :  { %v1345_v0 = vmul.f32 %v4846_v11, %v4846_v11  ;;  %v1787_v4 = vmul.f32 %v4848_v14, %v4848_v14 }
 0x14f   :  { %v3270_v44 = vpop.f32.mrf.mxu0  ;;  %v3410_v45 = vpop.f32.mrf.mxu1 }
 0x150   :  { %v1389_v45 = vpack.c.bf16 %v1335_v59, %v1334_v53 }
 0x151   :  { %v4850_v13 = vpop.f32.mrf.mxu0  ;;  %v4852_v18 = vpop.f32.mrf.mxu1  ;;  %3524 = vmatmul.mubr.bf16.gmra.mxu0 %v1386_v15  ;;  %3672 = vmatmul.mubr.bf16.gmra.mxu1 %v1828_v41  ;;  %v1776_v15 = vmul.f32 %v4732_v12, %v4732_v12  ;;  %v1336_v12 = vmul.f32 %v4750_v20, %v4750_v20 }
 0x152   :  { %3527 = vmatprep.mubr.msk.bf16.mxu0 %vm4143_vm0, %v4142_v1  ;;  %3675 = vmatprep.mubr.msk.bf16.mxu1 %vm4143_vm0, %v4142_v1 }
 0x153   :  { %v3273_v23 = vpop.f32.mrf.mxu0  ;;  %v3413_v28 = vpop.f32.mrf.mxu1  ;;  %v1831_v16 = vpack.c.bf16 %v1777_v62, %v1776_v15 }
 0x155   :  { %v4866_v21 = vpop.f32.mrf.mxu0  ;;  %v4868_v24 = vpop.f32.mrf.mxu1 }
 0x156   :  { %v1347_v11 = vmul.f32 %v4866_v21, %v4866_v21  ;;  %v1789_v14 = vmul.f32 %v4868_v24, %v4868_v24 }
 0x157   :  { %v3274_v54 = vpop.f32.mrf.mxu0  ;;  %v3414_v55 = vpop.f32.mrf.mxu1 }
 0x158   :  { %v1390_v55 = vpack.c.bf16 %v1337_v26, %v1336_v12 }
 0x159   :  { %v4870_v29 = vpop.f32.mrf.mxu0  ;;  %v4872_v42 = vpop.f32.mrf.mxu1  ;;  %3528 = vmatmul.mubr.bf16.gmra.mxu0 %v1387_v25  ;;  %3676 = vmatmul.mubr.bf16.gmra.mxu1 %v1829_v51  ;;  %v1778_v25 = vmul.f32 %v4752_v38, %v4752_v38  ;;  %v1338_v38 = vmul.f32 %v4770_v30, %v4770_v30 }
 0x15a   :  { %3531 = vmatprep.mubr.msk.bf16.mxu0 %vm4143_vm0, %v4142_v1  ;;  %3679 = vmatprep.mubr.msk.bf16.mxu1 %vm4143_vm0, %v4142_v1 }
 0x15b   :  { %v3277_v47 = vpop.f32.mrf.mxu0  ;;  %v3417_v52 = vpop.f32.mrf.mxu1  ;;  %v1832_v32 = vpack.c.bf16 %v1779_v27, %v1778_v25 }
 0x15d   :  { %v4886_v31 = vpop.f32.mrf.mxu0  ;;  %v4888_v34 = vpop.f32.mrf.mxu1 }
 0x15e   :  { %v1349_v21 = vmul.f32 %v4886_v31, %v4886_v31  ;;  %v1791_v24 = vmul.f32 %v4888_v34, %v4888_v34 }
 0x15f   :  { %v3278_v3 = vpop.f32.mrf.mxu0  ;;  %v3418_v6 = vpop.f32.mrf.mxu1 }
 0x160   :  { %v1391_v6 = vpack.c.bf16 %v1339_v48, %v1338_v38 }
 0x161   :  { %v4890_v63 = vpop.f32.mrf.mxu0  ;;  %v4892_v58 = vpop.f32.mrf.mxu1  ;;  %3532 = vmatmul.mubr.bf16.gmra.mxu0 %v1388_v35  ;;  %3680 = vmatmul.mubr.bf16.gmra.mxu1 %v1830_v61  ;;  %v1780_v35 = vmul.f32 %v4772_v56, %v4772_v56  ;;  %v1340_v56 = vmul.f32 %v4790_v40, %v4790_v40 }
 0x162   :  { %3535 = vmatprep.mubr.msk.bf16.mxu0 %vm4143_vm0, %v4142_v1  ;;  %3683 = vmatprep.mubr.msk.bf16.mxu1 %vm4143_vm0, %v4142_v1 }
 0x163   :  { %v3281_v2 = vpop.f32.mrf.mxu0  ;;  %v3421_v9 = vpop.f32.mrf.mxu1  ;;  %v1833_v53 = vpack.c.bf16 %v1781_v49, %v1780_v35 }
 0x165   :  { %v4906_v41 = vpop.f32.mrf.mxu0  ;;  %v4908_v44 = vpop.f32.mrf.mxu1 }
 0x166   :  { %v1351_v31 = vmul.f32 %v4906_v41, %v4906_v41  ;;  %v1793_v34 = vmul.f32 %v4908_v44, %v4908_v44 }
 0x167   :  { %v3282_v19 = vpop.f32.mrf.mxu0  ;;  %v3422_v22 = vpop.f32.mrf.mxu1 }
 0x168   :  { %v1392_v22 = vpack.c.bf16 %v1341_v7, %v1340_v56 }
 0x169   :  { %v4910_v10 = vpop.f32.mrf.mxu0  ;;  %v4912_v23 = vpop.f32.mrf.mxu1  ;;  %3536 = vmatmul.mubr.bf16.gmra.mxu0 %v1389_v45  ;;  %3684 = vmatmul.mubr.bf16.gmra.mxu1 %v1831_v16  ;;  %v1782_v45 = vmul.f32 %v4792_v17, %v4792_v17  ;;  %v1342_v17 = vmul.f32 %v4810_v50, %v4810_v50 }
 0x16a   :  { %3539 = vmatprep.mubr.msk.bf16.mxu0 %vm4143_vm0, %v4142_v1  ;;  %3687 = vmatprep.mubr.msk.bf16.mxu1 %vm4143_vm0, %v4142_v1 }
 0x16b   :  { %v3285_v28 = vpop.f32.mrf.mxu0  ;;  %v3425_v37 = vpop.f32.mrf.mxu1  ;;  %v1834_v12 = vpack.c.bf16 %v1783_v8, %v1782_v45 }
 0x16d   :  { %v4926_v51 = vpop.f32.mrf.mxu0  ;;  %v4928_v54 = vpop.f32.mrf.mxu1 }
 0x16e   :  { %v1353_v41 = vmul.f32 %v4926_v51, %v4926_v51  ;;  %v1795_v44 = vmul.f32 %v4928_v54, %v4928_v54 }
 0x16f   :  { %v3286_v43 = vpop.f32.mrf.mxu0  ;;  %v3426_v46 = vpop.f32.mrf.mxu1 }
 0x170   :  { %v1393_v46 = vpack.c.bf16 %v1343_v33, %v1342_v17 }
 0x171   :  { %v4930_v20 = vpop.f32.mrf.mxu0  ;;  %v4932_v47 = vpop.f32.mrf.mxu1  ;;  %3540 = vmatmul.mubr.bf16.gmra.mxu0 %v1390_v55  ;;  %3688 = vmatmul.mubr.bf16.gmra.mxu1 %v1832_v32  ;;  %v1784_v55 = vmul.f32 %v4812_v39, %v4812_v39  ;;  %v1344_v39 = vmul.f32 %v4830_v60, %v4830_v60 }
 0x172   :  { %3543 = vmatprep.mubr.msk.bf16.mxu0 %vm4143_vm0, %v4142_v1  ;;  %3691 = vmatprep.mubr.msk.bf16.mxu1 %vm4143_vm0, %v4142_v1 }
 0x173   :  { %v3289_v52 = vpop.f32.mrf.mxu0  ;;  %v3429_v5 = vpop.f32.mrf.mxu1  ;;  %v1835_v38 = vpack.c.bf16 %v1785_v36, %v1784_v55 }
 0x175   :  { %v4946_v61 = vpop.f32.mrf.mxu0  ;;  %v4948_v3 = vpop.f32.mrf.mxu1 }
 0x176   :  { %v1355_v51 = vmul.f32 %v4946_v61, %v4946_v61  ;;  %v1797_v54 = vmul.f32 %v4948_v3, %v4948_v3 }
 0x177   :  { %v3290_v59 = vpop.f32.mrf.mxu0  ;;  %v3430_v62 = vpop.f32.mrf.mxu1 }
 0x178   :  { %v1394_v62 = vpack.c.bf16 %v1345_v0, %v1344_v39 }
 0x179   :  { %v4950_v30 = vpop.f32.mrf.mxu0  ;;  %v4952_v2 = vpop.f32.mrf.mxu1  ;;  %3544 = vmatmul.mubr.bf16.gmra.mxu0 %v1391_v6  ;;  %3692 = vmatmul.mubr.bf16.gmra.mxu1 %v1833_v53  ;;  %v1786_v6 = vmul.f32 %v4832_v57, %v4832_v57  ;;  %v1346_v57 = vmul.f32 %v4850_v13, %v4850_v13 }
 0x17a   :  { %3547 = vmatprep.mubr.msk.bf16.mxu0 %vm4143_vm0, %v4142_v1  ;;  %3695 = vmatprep.mubr.msk.bf16.mxu1 %vm4143_vm0, %v4142_v1 }
 0x17b   :  { %v3293_v9 = vpop.f32.mrf.mxu0  ;;  %v3433_v15 = vpop.f32.mrf.mxu1  ;;  %v1836_v56 = vpack.c.bf16 %v1787_v4, %v1786_v6 }
 0x17d   :  { %v4966_v16 = vpop.f32.mrf.mxu0  ;;  %v4968_v19 = vpop.f32.mrf.mxu1 }
 0x17e   :  { %v1357_v61 = vmul.f32 %v4966_v16, %v4966_v16  ;;  %v1799_v3 = vmul.f32 %v4968_v19, %v4968_v19 }
 0x17f   :  { %v3294_v26 = vpop.f32.mrf.mxu0  ;;  %v3434_v27 = vpop.f32.mrf.mxu1 }
 0x180   :  { %v1395_v27 = vpack.c.bf16 %v1347_v11, %v1346_v57 }
 0x181   :  { %v4970_v40 = vpop.f32.mrf.mxu0  ;;  %v4972_v28 = vpop.f32.mrf.mxu1  ;;  %3548 = vmatmul.mubr.bf16.gmra.mxu0 %v1392_v22  ;;  %3696 = vmatmul.mubr.bf16.gmra.mxu1 %v1834_v12  ;;  %v1788_v22 = vmul.f32 %v4852_v18, %v4852_v18  ;;  %v1348_v18 = vmul.f32 %v4870_v29, %v4870_v29 }
 0x182   :  { %3551 = vmatprep.mubr.msk.bf16.mxu0 %vm4143_vm0, %v4142_v1  ;;  %3699 = vmatprep.mubr.msk.bf16.mxu1 %vm4143_vm0, %v4142_v1 }
 0x183   :  { %v3297_v37 = vpop.f32.mrf.mxu0  ;;  %v3437_v25 = vpop.f32.mrf.mxu1  ;;  %v1837_v17 = vpack.c.bf16 %v1789_v14, %v1788_v22 }
 0x185   :  { %v4986_v32 = vpop.f32.mrf.mxu0  ;;  %v4988_v43 = vpop.f32.mrf.mxu1 }
 0x186   :  { %v1359_v16 = vmul.f32 %v4986_v32, %v4986_v32  ;;  %v1801_v19 = vmul.f32 %v4988_v43, %v4988_v43 }
 0x187   :  { %v3298_v48 = vpop.f32.mrf.mxu0  ;;  %v3438_v49 = vpop.f32.mrf.mxu1 }
 0x188   :  { %v1396_v49 = vpack.c.bf16 %v1349_v21, %v1348_v18 }
 0x189   :  { %v4990_v50 = vpop.f32.mrf.mxu0  ;;  %v4992_v52 = vpop.f32.mrf.mxu1  ;;  %3552 = vmatmul.mubr.bf16.gmra.mxu0 %v1393_v46  ;;  %3700 = vmatmul.mubr.bf16.gmra.mxu1 %v1835_v38  ;;  %v1790_v46 = vmul.f32 %v4872_v42, %v4872_v42  ;;  %v1350_v42 = vmul.f32 %v4890_v63, %v4890_v63 }
 0x18a   :  { %3555 = vmatprep.mubr.msk.bf16.mxu0 %vm4143_vm0, %v4142_v1  ;;  %3703 = vmatprep.mubr.msk.bf16.mxu1 %vm4143_vm0, %v4142_v1 }
 0x18b   :  { %v3301_v5 = vpop.f32.mrf.mxu0  ;;  %v3441_v35 = vpop.f32.mrf.mxu1  ;;  %v1838_v39 = vpack.c.bf16 %v1791_v24, %v1790_v46 }
 0x18d   :  { %v5006_v53 = vpop.f32.mrf.mxu0  ;;  %v5008_v59 = vpop.f32.mrf.mxu1 }
 0x18e   :  { %v1361_v32 = vmul.f32 %v5006_v53, %v5006_v53  ;;  %v1803_v43 = vmul.f32 %v5008_v59, %v5008_v59 }
 0x18f   :  { %v3302_v7 = vpop.f32.mrf.mxu0  ;;  %v3442_v8 = vpop.f32.mrf.mxu1 }
 0x190   :  { %v1397_v8 = vpack.c.bf16 %v1351_v31, %v1350_v42 }
 0x191   :  { %v5010_v60 = vpop.f32.mrf.mxu0  ;;  %v5012_v9 = vpop.f32.mrf.mxu1  ;;  %3556 = vmatmul.mubr.bf16.gmra.mxu0 %v1394_v62  ;;  %3704 = vmatmul.mubr.bf16.gmra.mxu1 %v1836_v56  ;;  %v1792_v62 = vmul.f32 %v4892_v58, %v4892_v58  ;;  %v1352_v58 = vmul.f32 %v4910_v10, %v4910_v10 }
 0x192   :  { %3559 = vmatprep.mubr.msk.bf16.mxu0 %vm4143_vm0, %v4142_v1  ;;  %3707 = vmatprep.mubr.msk.bf16.mxu1 %vm4143_vm0, %v4142_v1 }
 0x193   :  { %v3305_v15 = vpop.f32.mrf.mxu0  ;;  %v3445_v45 = vpop.f32.mrf.mxu1  ;;  %v1839_v57 = vpack.c.bf16 %v1793_v34, %v1792_v62 }
 0x195   :  { %v5026_v12 = vpop.f32.mrf.mxu0  ;;  %v5028_v26 = vpop.f32.mrf.mxu1 }
 0x196   :  { %v1363_v53 = vmul.f32 %v5026_v12, %v5026_v12  ;;  %v1805_v59 = vmul.f32 %v5028_v26, %v5028_v26 }
 0x197   :  { %v3306_v33 = vpop.f32.mrf.mxu0  ;;  %v3446_v36 = vpop.f32.mrf.mxu1 }
 0x198   :  { %v1398_v36 = vpack.c.bf16 %v1353_v41, %v1352_v58 }
 0x199   :  { %v5030_v13 = vpop.f32.mrf.mxu0  ;;  %v5032_v37 = vpop.f32.mrf.mxu1  ;;  %3560 = vmatmul.mubr.bf16.gmra.mxu0 %v1395_v27  ;;  %3708 = vmatmul.mubr.bf16.gmra.mxu1 %v1837_v17  ;;  %v1794_v27 = vmul.f32 %v4912_v23, %v4912_v23  ;;  %v1354_v23 = vmul.f32 %v4930_v20, %v4930_v20 }
 0x19a   :  { %3563 = vmatprep.mubr.msk.bf16.mxu0 %vm4143_vm0, %v4142_v1  ;;  %3711 = vmatprep.mubr.msk.bf16.mxu1 %vm4143_vm0, %v4142_v1 }
 0x19b   :  { %v3309_v25 = vpop.f32.mrf.mxu0  ;;  %v3449_v55 = vpop.f32.mrf.mxu1  ;;  %v1840_v18 = vpack.c.bf16 %v1795_v44, %v1794_v27 }
 0x19d   :  { %v5046_v38 = vpop.f32.mrf.mxu0  ;;  %v5048_v48 = vpop.f32.mrf.mxu1 }
 0x19e   :  { %v1365_v26 = vmul.f32 %v5046_v38, %v5046_v38 }
 0x19f   :  { %v3310_v0 = vpop.f32.mrf.mxu0  ;;  %v3450_v4 = vpop.f32.mrf.mxu1 }
 0x1a0   :  { %v1399_v4 = vpack.c.bf16 %v1355_v51, %v1354_v23 }
 0x1a1   :  { %v5050_v29 = vpop.f32.mrf.mxu0  ;;  %v5052_v5 = vpop.f32.mrf.mxu1  ;;  %3564 = vmatmul.mubr.bf16.gmra.mxu0 %v1396_v49  ;;  %3712 = vmatmul.mubr.bf16.gmra.mxu1 %v1838_v39  ;;  %v1796_v49 = vmul.f32 %v4932_v47, %v4932_v47  ;;  %v1356_v47 = vmul.f32 %v4950_v30, %v4950_v30 }
 0x1a2   :  { %3567 = vmatprep.mubr.msk.bf16.mxu0 %vm4143_vm0, %v4142_v1  ;;  %3715 = vmatprep.mubr.msk.bf16.mxu1 %vm4143_vm0, %v4142_v1 }
 0x1a3   :  { %v3313_v35 = vpop.f32.mrf.mxu0  ;;  %v3453_v6 = vpop.f32.mrf.mxu1  ;;  %v1841_v42 = vpack.c.bf16 %v1797_v54, %v1796_v49 }
 0x1a5   :  { %v5066_v56 = vpop.f32.mrf.mxu0  ;;  %v5068_v7 = vpop.f32.mrf.mxu1 }
 0x1a7   :  { %v3314_v11 = vpop.f32.mrf.mxu0  ;;  %v3454_v14 = vpop.f32.mrf.mxu1 }
 0x1a8   :  { %v1400_v14 = vpack.c.bf16 %v1357_v61, %v1356_v47 }
 0x1a9   :  { %v5070_v63 = vpop.f32.mrf.mxu0  ;;  %v5072_v15 = vpop.f32.mrf.mxu1  ;;  %3568 = vmatmul.mubr.bf16.gmra.mxu0 %v1397_v8  ;;  %3716 = vmatmul.mubr.bf16.gmra.mxu1 %v1839_v57  ;;  %v1798_v8 = vmul.f32 %v4952_v2, %v4952_v2  ;;  %v1358_v2 = vmul.f32 %v4970_v40, %v4970_v40 }
 0x1aa   :  { %3571 = vmatprep.mubr.msk.bf16.mxu0 %vm4143_vm0, %v4142_v1  ;;  %3719 = vmatprep.mubr.msk.bf16.mxu1 %vm4143_vm0, %v4142_v1 }
 0x1ab   :  { %v3317_v45 = vpop.f32.mrf.mxu0  ;;  %v3457_v22 = vpop.f32.mrf.mxu1  ;;  %v1842_v58 = vpack.c.bf16 %v1799_v3, %v1798_v8 }
 0x1ad   :  { %v5086_v17 = vpop.f32.mrf.mxu0  ;;  %v5088_v33 = vpop.f32.mrf.mxu1 }
 0x1af   :  { %v3318_v21 = vpop.f32.mrf.mxu0  ;;  %v3458_v24 = vpop.f32.mrf.mxu1 }
 0x1b0   :  { %v1401_v24 = vpack.c.bf16 %v1359_v16, %v1358_v2 }
 0x1b1   :  { %v5090_v10 = vpop.f32.mrf.mxu0  ;;  %v5092_v25 = vpop.f32.mrf.mxu1  ;;  %3572 = vmatmul.mubr.bf16.gmra.mxu0 %v1398_v36  ;;  %3720 = vmatmul.mubr.bf16.gmra.mxu1 %v1840_v18  ;;  %v1800_v36 = vmul.f32 %v4972_v28, %v4972_v28  ;;  %v1360_v28 = vmul.f32 %v4990_v50, %v4990_v50 }
 0x1b2   :  { %3575 = vmatprep.mubr.msk.bf16.mxu0 %vm4143_vm0, %v4142_v1  ;;  %3723 = vmatprep.mubr.msk.bf16.mxu1 %vm4143_vm0, %v4142_v1 }
 0x1b3   :  { %v3321_v55 = vpop.f32.mrf.mxu0  ;;  %v3461_v46 = vpop.f32.mrf.mxu1  ;;  %v1843_v23 = vpack.c.bf16 %v1801_v19, %v1800_v36  ;;  %v1807_v36 = vmul.f32 %v5048_v48, %v5048_v48 }
 0x1b5   :  { %v5106_v39 = vpop.f32.mrf.mxu0  ;;  %v5108_v0 = vpop.f32.mrf.mxu1 }
 0x1b7   :  { %v3322_v31 = vpop.f32.mrf.mxu0  ;;  %v3462_v34 = vpop.f32.mrf.mxu1 }
 0x1b8   :  { %v1402_v34 = vpack.c.bf16 %v1361_v32, %v1360_v28 }
 0x1b9   :  { %v5110_v20 = vpop.f32.mrf.mxu0  ;;  %v5112_v35 = vpop.f32.mrf.mxu1  ;;  %3576 = vmatmul.mubr.bf16.gmra.mxu0 %v1399_v4  ;;  %3724 = vmatmul.mubr.bf16.gmra.mxu1 %v1841_v42  ;;  %v1802_v4 = vmul.f32 %v4992_v52, %v4992_v52  ;;  %v1362_v52 = vmul.f32 %v5010_v60, %v5010_v60 }
 0x1ba   :  { %3579 = vmatprep.mubr.msk.bf16.mxu0 %vm4143_vm0, %v4142_v1  ;;  %3727 = vmatprep.mubr.msk.bf16.mxu1 %vm4143_vm0, %v4142_v1 }
 0x1bb   :  { %v3325_v6 = vpop.f32.mrf.mxu0  ;;  %v3465_v62 = vpop.f32.mrf.mxu1  ;;  %v1844_v47 = vpack.c.bf16 %v1803_v43, %v1802_v4 }
 0x1bd   :  { %v5126_v57 = vpop.f32.mrf.mxu0  ;;  %v5128_v11 = vpop.f32.mrf.mxu1 }
 0x1bf   :  { %v3326_v41 = vpop.f32.mrf.mxu0  ;;  %v3466_v44 = vpop.f32.mrf.mxu1 }
 0x1c0   :  { %v1403_v44 = vpack.c.bf16 %v1363_v53, %v1362_v52  ;;  %v1367_v53 = vmul.f32 %v5066_v56, %v5066_v56 }
 0x1c1   :  { %v5130_v30 = vpop.f32.mrf.mxu0  ;;  %v5132_v45 = vpop.f32.mrf.mxu1  ;;  %3580 = vmatmul.mubr.bf16.gmra.mxu0 %v1400_v14  ;;  %3728 = vmatmul.mubr.bf16.gmra.mxu1 %v1842_v58  ;;  %v1804_v14 = vmul.f32 %v5012_v9, %v5012_v9  ;;  %v1364_v9 = vmul.f32 %v5030_v13, %v5030_v13 }
 0x1c2   :  { %3583 = vmatprep.mubr.msk.bf16.mxu0 %vm4143_vm0, %v4142_v1  ;;  %3731 = vmatprep.mubr.msk.bf16.mxu1 %vm4143_vm0, %v4142_v1 }
 0x1c3   :  { %v3329_v22 = vpop.f32.mrf.mxu0  ;;  %v3469_v27 = vpop.f32.mrf.mxu1  ;;  %v1845_v2 = vpack.c.bf16 %v1805_v59, %v1804_v14  ;;  %v1809_v59 = vmul.f32 %v5068_v7, %v5068_v7 }
 0x1c5   :  { %v5146_v18 = vpop.f32.mrf.mxu0  ;;  %v5148_v21 = vpop.f32.mrf.mxu1 }
 0x1c7   :  { %v3330_v51 = vpop.f32.mrf.mxu0  ;;  %v3470_v54 = vpop.f32.mrf.mxu1 }
 0x1c8   :  { %v1806_v51 = vmul.f32 %v5032_v37, %v5032_v37  ;;  %v1366_v37 = vmul.f32 %v5050_v29, %v5050_v29 }
 0x1c9   :  { %v5150_v40 = vpop.f32.mrf.mxu0  ;;  %v5152_v55 = vpop.f32.mrf.mxu1  ;;  %3584 = vmatmul.mubr.bf16.gmra.mxu0 %v1401_v24  ;;  %3732 = vmatmul.mubr.bf16.gmra.mxu1 %v1843_v23 }
 0x1ca   :  { %3587 = vmatprep.mubr.msk.bf16.mxu0 %vm4143_vm0, %v4142_v1  ;;  %3735 = vmatprep.mubr.msk.bf16.mxu1 %vm4143_vm0, %v4142_v1 }
 0x1cb   :  { %v3333_v46 = vpop.f32.mrf.mxu0  ;;  %v3473_v49 = vpop.f32.mrf.mxu1 }
 0x1cc   :  { %v1404_v46 = vpack.c.bf16 %v1365_v26, %v1364_v9  ;;  %v1846_v49 = vpack.c.bf16 %v1807_v36, %v1806_v51  ;;  %v1369_v51 = vmul.f32 %v5086_v17, %v5086_v17 }
 0x1cd   :  { %v5166_v42 = vpop.f32.mrf.mxu0  ;;  %v5168_v31 = vpop.f32.mrf.mxu1 }
 0x1cf   :  { %v3334_v61 = vpop.f32.mrf.mxu0  ;;  %v3474_v3 = vpop.f32.mrf.mxu1 }
 0x1d1   :  { %v5170_v50 = vpop.f32.mrf.mxu0  ;;  %v5172_v6 = vpop.f32.mrf.mxu1  ;;  %3588 = vmatmul.mubr.bf16.gmra.mxu0 %v1402_v34  ;;  %3736 = vmatmul.mubr.bf16.gmra.mxu1 %v1844_v47 }
 0x1d2   :  { %3591 = vmatprep.mubr.msk.bf16.mxu0 %vm4143_vm0, %v4142_v1  ;;  %3739 = vmatprep.mubr.msk.bf16.mxu1 %vm4143_vm0, %v4142_v1 }
 0x1d3   :  { %v3337_v62 = vpop.f32.mrf.mxu0  ;;  %v3477_v8 = vpop.f32.mrf.mxu1 }
 0x1d5   :  { %v688_v58 = vpop.f32.mrf.mxu0  ;;  %v1311_v41 = vpop.f32.mrf.mxu1 }
 0x1d6   :  { %v1808_v58 = vmul.f32 %v5052_v5, %v5052_v5 }
 0x1d7   :  { %v3338_v16 = vpop.f32.mrf.mxu0  ;;  %v3478_v19 = vpop.f32.mrf.mxu1 }
 0x1d8   :  { %v1405_v19 = vpack.c.bf16 %v1367_v53, %v1366_v37 }
 0x1d9   :  { %v1494_v22 = vpop.f32.mrf.mxu0  ;;  %3592 = vmatmul.mubr.bf16.gmra.mxu0 %v1403_v44  ;;  %v1888_v60 = vpop.f32.mrf.mxu1  ;;  %3740 = vmatmul.mubr.bf16.gmra.mxu1 %v1845_v2 }
 0x1da   :  { %v2150_v27 = vsub.f32 %v1494_v22, %v1888_v60  ;;  %v2418_v12 = vadd.f32 1e-05, %v1888_v60  ;;  %3595 = vmatprep.mubr.msk.bf16.mxu0 %vm4143_vm0, %v4142_v1  ;;  %3743 = vmatprep.mubr.msk.bf16.mxu1 %vm4143_vm0, %v4142_v1  ;;  %v1847_v60 = vpack.c.bf16 %v1809_v59, %v1808_v58 }
 0x1db   :  { %v3497_v24 = vpop.f32.mrf.mxu0  ;;  %v3645_v23 = vpop.f32.mrf.mxu1 }
 0x1dc   :  { %3860 = vrcp.f32 %v2418_v12  ;;  %v2215_v34 = vand.u32 2147483647, %v2150_v27  ;;  %v2353_v12 = vadd.f32 1e-05, %v1494_v22  ;;  %v1368_v22 = vmul.f32 %v5070_v63, %v5070_v63 }
 0x1dd   :  { %v1497_v54 = vpop.f32.mrf.mxu0  ;;  %v1891_v28 = vpop.f32.mrf.mxu1 }
 0x1de   :  { %v2151_v32 = vsub.f32 %v1497_v54, %v1891_v28  ;;  %v2419_v43 = vadd.f32 1e-05, %v1891_v28  ;;  %v1811_v28 = vmul.f32 %v5088_v33, %v5088_v33 }
 0x1df   :  { %v3498_v4 = vpop.f32.mrf.mxu0  ;;  %v3646_v13 = vpop.f32.mrf.mxu1 }
 0x1e0   :  { %v2216_v47 = vand.u32 2147483647, %v2151_v32  ;;  %3862 = vrcp.f32 %v2419_v43 }
 0x1e1   :  { %v1502_v38 = vpop.f32.mrf.mxu0  ;;  %3596 = vmatmul.mubr.bf16.gmra.mxu0 %v1404_v46  ;;  %v1896_v48 = vpop.f32.mrf.mxu1  ;;  %3744 = vmatmul.mubr.bf16.gmra.mxu1 %v1846_v49  ;;  %v2354_v49 = vadd.f32 1e-05, %v1497_v54 }
 0x1e2   :  { %v2280_v61 = vadd.f32 %v2216_v47, %v2215_v34  ;;  %v2152_v3 = vsub.f32 %v1502_v38, %v1896_v48  ;;  %v2420_v52 = vadd.f32 1e-05, %v1896_v48  ;;  %3599 = vmatprep.mubr.msk.bf16.mxu0 %vm4143_vm0, %v4142_v1  ;;  %3747 = vmatprep.mubr.msk.bf16.mxu1 %vm4143_vm0, %v4142_v1  ;;  %v1810_v34 = vmul.f32 %v5072_v15, %v5072_v15 }
 0x1e3   :  { %v3501_v62 = vpop.f32.mrf.mxu0  ;;  %v3649_v8 = vpop.f32.mrf.mxu1  ;;  %v2355_v54 = vadd.f32 1e-05, %v1502_v38  ;;  %v1370_v38 = vmul.f32 %v5090_v10, %v5090_v10 }
 0x1e4   :  { %v2217_v14 = vand.u32 2147483647, %v2152_v3  ;;  %3864 = vrcp.f32 %v2420_v52  ;;  %v1406_v3 = vpack.c.bf16 %v1369_v51, %v1368_v22  ;;  %v1848_v33 = vpack.c.bf16 %v1811_v28, %v1810_v34 }
 0x1e5   :  { %v5210_v41 = vpop.f32.mrf.mxu0  ;;  %v1899_v44 = vpop.f32.mrf.mxu1 }
 0x1e6   :  { %v2281_v2 = vadd.f32 %v2280_v61, %v2217_v14  ;;  %v2153_v16 = vsub.f32 %v5210_v41, %v1899_v44  ;;  %v2421_v29 = vadd.f32 1e-05, %v1899_v44 }
 0x1e7   :  { %v3502_v56 = vpop.f32.mrf.mxu0  ;;  %v3650_v27 = vpop.f32.mrf.mxu1 }
 0x1e8   :  { %v2218_v7 = vand.u32 2147483647, %v2153_v16  ;;  %3866 = vrcp.f32 %v2421_v29  ;;  %v1813_v16 = vmul.f32 %v5108_v0, %v5108_v0  ;;  %v2356_v56 = vadd.f32 1e-05, %v5210_v41 }
 0x1e9   :  { %v3861_v9 = vpop.eup %3860  ;;  %v5213_v26 = vpop.f32.mrf.mxu0  ;;  %3600 = vmatmul.mubr.bf16.gmra.mxu0 %v1405_v19  ;;  %3748 = vmatmul.mubr.bf16.gmra.mxu1 %v1847_v60 }
 0x1ea   :  { %v1904_v36 = vpop.f32.mrf.mxu1  ;;  %v2484_v5 = vmul.f32 %v3861_v9, %v2353_v12  ;;  %v2282_v24 = vadd.f32 %v2281_v2, %v2218_v7  ;;  %3603 = vmatprep.mubr.msk.bf16.mxu0 %vm4143_vm0, %v4142_v1  ;;  %3751 = vmatprep.mubr.msk.bf16.mxu1 %vm4143_vm0, %v4142_v1  ;;  %v1371_v2 = vmul.f32 %v5106_v39, %v5106_v39 }
 0x1eb   :  { %v2154_v23 = vsub.f32 %v5213_v26, %v1904_v36  ;;  %v2422_v32 = vadd.f32 1e-05, %v1904_v36  ;;  %v3505_v43 = vpop.f32.mrf.mxu0  ;;  %v1812_v7 = vmul.f32 %v5092_v25, %v5092_v25  ;;  %v2357_v25 = vadd.f32 1e-05, %v5213_v26 }
 0x1ec   :  { %v3653_v46 = vpop.f32.mrf.mxu1  ;;  %3868 = vlog2.f32 %v2484_v5  ;;  %v1407_v0 = vpack.c.bf16 %v1371_v2, %v1370_v38 }
 0x1ed   :  { %v2219_v4 = vand.u32 2147483647, %v2154_v23  ;;  %v3863_v13 = vpop.eup %3862  ;;  %3870 = vrcp.f32 %v2422_v32  ;;  %v5228_v47 = vpop.f32.mrf.mxu0  ;;  %v1372_v32 = vmul.f32 %v5110_v20, %v5110_v20  ;;  %v1815_v20 = vmul.f32 %v5128_v11, %v5128_v11 }
 0x1ee   :  { %v1907_v63 = vpop.f32.mrf.mxu1  ;;  %v2486_v48 = vmul.f32 %v3863_v13, %v2354_v49 }
 0x1ef   :  { %v2283_v61 = vadd.f32 %v2282_v24, %v2219_v4  ;;  %v2155_v17 = vsub.f32 %v5228_v47, %v1907_v63  ;;  %v2423_v52 = vadd.f32 1e-05, %v1907_v63  ;;  %v3506_v37 = vpop.f32.mrf.mxu0  ;;  %v1849_v24 = vpack.c.bf16 %v1813_v16, %v1812_v7 }
 0x1f0   :  { %v3654_v53 = vpop.f32.mrf.mxu1  ;;  %3872 = vlog2.f32 %v2486_v48  ;;  %v1373_v4 = vmul.f32 %v5126_v57, %v5126_v57  ;;  %v1814_v57 = vmul.f32 %v5112_v35, %v5112_v35  ;;  %v1374_v35 = vmul.f32 %v5130_v30, %v5130_v30 }
 0x1f1   :  { %v2220_v59 = vand.u32 2147483647, %v2155_v17  ;;  %v3865_v62 = vpop.eup %3864  ;;  %3874 = vrcp.f32 %v2423_v52  ;;  %v5231_v8 = vpop.f32.mrf.mxu0  ;;  %3604 = vmatmul.mubr.bf16.gmra.mxu0 %v1406_v3  ;;  %3752 = vmatmul.mubr.bf16.gmra.mxu1 %v1848_v33  ;;  %v2358_v52 = vadd.f32 1e-05, %v5228_v47 }
 0x1f2   :  { %v1912_v15 = vpop.f32.mrf.mxu1  ;;  %v2488_v14 = vmul.f32 %v3865_v62, %v2355_v54  ;;  %3607 = vmatprep.mubr.msk.bf16.mxu0 %vm4143_vm0, %v4142_v1  ;;  %3755 = vmatprep.mubr.msk.bf16.mxu1 %vm4143_vm0, %v4142_v1 }
 0x1f3   :  { %v2284_v58 = vadd.f32 %v2283_v61, %v2220_v59  ;;  %v2156_v44 = vsub.f32 %v5231_v8, %v1912_v15  ;;  %v2424_v29 = vadd.f32 1e-05, %v1912_v15  ;;  %v3509_v19 = vpop.f32.mrf.mxu0  ;;  %v1408_v59 = vpack.c.bf16 %v1373_v4, %v1372_v32 }
 0x1f4   :  { %v3657_v60 = vpop.f32.mrf.mxu1  ;;  %3876 = vlog2.f32 %v2488_v14  ;;  %v1850_v15 = vpack.c.bf16 %v1815_v20, %v1814_v57  ;;  %v1375_v19 = vmul.f32 %v5146_v18, %v5146_v18 }
 0x1f5   :  { %v2221_v27 = vand.u32 2147483647, %v2156_v44  ;;  %v3867_v12 = vpop.eup %3866  ;;  %3878 = vrcp.f32 %v2424_v29  ;;  %v5247_v9 = vpop.f32.mrf.mxu0  ;;  %v2359_v60 = vadd.f32 1e-05, %v5231_v8 }
 0x1f6   :  { %v1915_v10 = vpop.f32.mrf.mxu1  ;;  %v2490_v36 = vmul.f32 %v3867_v12, %v2356_v56 }
 0x1f7   :  { %v2285_v39 = vadd.f32 %v2284_v58, %v2221_v27  ;;  %v2157_v5 = vsub.f32 %v5247_v9, %v1915_v10  ;;  %v2425_v23 = vadd.f32 1e-05, %v1915_v10  ;;  %v3510_v22 = vpop.f32.mrf.mxu0  ;;  %v1817_v10 = vmul.f32 %v5148_v21, %v5148_v21 }
 0x1f8   :  { %v3658_v51 = vpop.f32.mrf.mxu1  ;;  %3880 = vlog2.f32 %v2490_v36 }
 0x1f9   :  { %v2222_v41 = vand.u32 2147483647, %v2157_v5  ;;  %v3869_v28 = vpop.eup %3868  ;;  %3882 = vrcp.f32 %v2425_v23  ;;  %v5253_v43 = vpop.f32.mrf.mxu0  ;;  %3608 = vmatmul.mubr.bf16.gmra.mxu0 %v1407_v0  ;;  %3756 = vmatmul.mubr.bf16.gmra.mxu1 %v1849_v24  ;;  %v1816_v23 = vmul.f32 %v5132_v45, %v5132_v45  ;;  %v1409_v51 = vpack.c.bf16 %v1375_v19, %v1374_v35 }
 0x1fa   :  { %v1920_v46 = vpop.f32.mrf.mxu1  ;;  %v3871_v49 = vpop.eup %3870  ;;  %3611 = vmatprep.mubr.msk.bf16.mxu0 %vm4143_vm0, %v4142_v1  ;;  %3759 = vmatprep.mubr.msk.bf16.mxu1 %vm4143_vm0, %v4142_v1  ;;  %v2614_v17 = vmul.f32 0.6931472, %v3869_v28 }
 0x1fb   :  { %v2286_v13 = vadd.f32 %v2285_v39, %v2222_v41  ;;  %v2158_v34 = vsub.f32 %v5253_v43, %v1920_v46  ;;  %v2492_v26 = vmul.f32 %v3871_v49, %v2357_v25  ;;  %v2426_v63 = vadd.f32 1e-05, %v1920_v46  ;;  %v3513_v48 = vpop.f32.mrf.mxu0 }
 0x1fc   :  { %v3661_v61 = vpop.f32.mrf.mxu1  ;;  %v2743_v16 = vmul.f32 %v2614_v17, %v2614_v17  ;;  %v2360_v41 = vadd.f32 1e-05, %v5247_v9  ;;  %v1851_v49 = vpack.c.bf16 %v1817_v10, %v1816_v23  ;;  %v1376_v9 = vmul.f32 %v5150_v40, %v5150_v40 }
 0x1fd   :  { %v2223_v3 = vand.u32 2147483647, %v2158_v34  ;;  %v3873_v33 = vpop.eup %3872  ;;  %3884 = vlog2.f32 %v2492_v26  ;;  %v5267_v37 = vpop.f32.mrf.mxu0  ;;  %v1377_v17 = vmul.f32 %v5166_v42, %v5166_v42  ;;  %v1819_v42 = vmul.f32 %v5168_v31, %v5168_v31 }
 0x1fe   :  { %v1923_v53 = vpop.f32.mrf.mxu1  ;;  %v3875_v54 = vpop.eup %3874  ;;  %v2616_v62 = vmul.f32 0.6931472, %v3873_v33  ;;  %3886 = vrcp.f32 %v2426_v63  ;;  %v2362_v31 = vadd.f32 1e-05, %v5267_v37 }
 0x1ff   :  { %v2287_v11 = vadd.f32 %v2286_v13, %v2223_v3  ;;  %v2494_v14 = vmul.f32 %v3875_v54, %v2358_v52  ;;  %v2159_v58 = vsub.f32 %v5267_v37, %v1923_v53  ;;  %v2427_v44 = vadd.f32 1e-05, %v1923_v53  ;;  %v3514_v38 = vpop.f32.mrf.mxu0 }
 0x200   :  { %v3662_v2 = vpop.f32.mrf.mxu1  ;;  %v2744_v47 = vmul.f32 %v2616_v62, %v2616_v62  ;;  %v2361_v54 = vadd.f32 1e-05, %v5253_v43  ;;  %v1818_v38 = vmul.f32 %v5152_v55, %v5152_v55 }
 0x201   :  { %v3877_v29 = vpop.eup %3876  ;;  %3888 = vlog2.f32 %v2494_v14  ;;  %v2224_v56 = vand.u32 2147483647, %v2159_v58  ;;  %v5275_v27 = vpop.f32.mrf.mxu0  ;;  %3612 = vmatmul.mubr.bf16.gmra.mxu0 %v1408_v59  ;;  %3760 = vmatmul.mubr.bf16.gmra.mxu1 %v1850_v15  ;;  %v1410_v2 = vpack.c.bf16 %v1377_v17, %v1376_v9 }
 0x202   :  { %v1928_v12 = vpop.f32.mrf.mxu1  ;;  %v3879_v7 = vpop.eup %3878  ;;  %v2808_v30 = vadd.f32 %v2744_v47, %v2743_v16  ;;  %v2618_v36 = vmul.f32 0.6931472, %v3877_v29  ;;  %3890 = vrcp.f32 %v2427_v44  ;;  %3615 = vmatprep.mubr.msk.bf16.mxu0 %vm4143_vm0, %v4142_v1  ;;  %3763 = vmatprep.mubr.msk.bf16.mxu1 %vm4143_vm0, %v4142_v1  ;;  %v2363_v23 = vadd.f32 1e-05, %v5275_v27 }
 0x203   :  { %v2496_v18 = vmul.f32 %v3879_v7, %v2359_v60  ;;  %v2288_v8 = vadd.f32 %v2287_v11, %v2224_v56  ;;  %v2160_v39 = vsub.f32 %v5275_v27, %v1928_v12  ;;  %v2428_v5 = vadd.f32 1e-05, %v1928_v12  ;;  %v3517_v0 = vpop.f32.mrf.mxu0 }
 0x204   :  { %v3665_v24 = vpop.f32.mrf.mxu1  ;;  %v2745_v21 = vmul.f32 %v2618_v36, %v2618_v36  ;;  %v1852_v12 = vpack.c.bf16 %v1819_v42, %v1818_v38 }
 0x205   :  { %v3881_v22 = vpop.eup %3880  ;;  %3892 = vlog2.f32 %v2496_v18  ;;  %v2225_v28 = vand.u32 2147483647, %v2160_v39  ;;  %v5287_v32 = vpop.f32.mrf.mxu0  ;;  %v1378_v39 = vmul.f32 %v5170_v50, %v5170_v50 }
 0x206   :  { %v1931_v25 = vpop.f32.mrf.mxu1  ;;  %v3883_v46 = vpop.eup %3882  ;;  %v2809_v4 = vadd.f32 %v2808_v30, %v2745_v21  ;;  %v2620_v13 = vmul.f32 0.6931472, %v3881_v22  ;;  %3894 = vrcp.f32 %v2428_v5 }
 0x207   :  { %v2498_v34 = vmul.f32 %v3883_v46, %v2360_v41  ;;  %v2289_v20 = vadd.f32 %v2288_v8, %v2225_v28  ;;  %v2161_v26 = vsub.f32 %v5287_v32, %v1931_v25  ;;  %v2429_v45 = vadd.f32 1e-05, %v1931_v25  ;;  %v3518_v63 = vpop.f32.mrf.mxu0 }
 0x208   :  { %v3666_v48 = vpop.f32.mrf.mxu1  ;;  %v2746_v61 = vmul.f32 %v2620_v13, %v2620_v13  ;;  %v1411_v13 = vpack.c.bf16 %v1378_v39, %v1378_v39 }
 0x209   :  { %3896 = vlog2.f32 %v2498_v34  ;;  %v2226_v3 = vand.u32 2147483647, %v2161_v26  ;;  %v5294_v33 = vpop.f32.mrf.mxu0  ;;  %3616 = vmatmul.mubr.bf16.gmra.mxu0 %v1409_v51  ;;  %3764 = vmatmul.mubr.bf16.gmra.mxu1 %v1851_v49  ;;  %v1820_v51 = vmul.f32 %v5172_v6, %v5172_v6 }
 0x20a   :  { %v1936_v57 = vpop.f32.mrf.mxu1  ;;  %v3885_v52 = vpop.eup %3884  ;;  %v2810_v53 = vadd.f32 %v2809_v4, %v2746_v61  ;;  %3898 = vrcp.f32 %v2429_v45  ;;  %3619 = vmatprep.mubr.msk.bf16.mxu0 %vm4143_vm0, %v4142_v1  ;;  %3767 = vmatprep.mubr.msk.bf16.mxu1 %vm4143_vm0, %v4142_v1 }
 0x20b   :  { %v2162_v59 = vsub.f32 %v5294_v33, %v1936_v57  ;;  %v3887_v40 = vpop.eup %3886  ;;  %v2622_v62 = vmul.f32 0.6931472, %v3885_v52  ;;  %v2290_v11 = vadd.f32 %v2289_v20, %v2226_v3  ;;  %v2430_v15 = vadd.f32 1e-05, %v1936_v57  ;;  %v3521_v14 = vpop.f32.mrf.mxu0 }
 0x20c   :  { %v3669_v58 = vpop.f32.mrf.mxu1  ;;  %v2500_v44 = vmul.f32 %v3887_v40, %v2361_v54  ;;  %v1853_v61 = vpack.c.bf16 %v1820_v51, %v1820_v51  ;;  %v2365_v40 = vadd.f32 1e-05, %v5294_v33 }
 0x20d   :  { %v2227_v43 = vand.u32 2147483647, %v2162_v59  ;;  %v2747_v35 = vmul.f32 %v2622_v62, %v2622_v62  ;;  %3900 = vrcp.f32 %v2430_v15  ;;  %v5306_v16 = vpop.f32.mrf.mxu0 }
 0x20e   :  { %v1939_v47 = vpop.f32.mrf.mxu1  ;;  %v3889_v29 = vpop.eup %3888  ;;  %3902 = vlog2.f32 %v2500_v44  ;;  %v2366_v33 = vadd.f32 1e-05, %v5306_v16 }
 0x20f   :  { %v2291_v19 = vadd.f32 %v2290_v11, %v2227_v43  ;;  %v2163_v60 = vsub.f32 %v5306_v16, %v1939_v47  ;;  %v3891_v56 = vpop.eup %3890  ;;  %v2811_v7 = vadd.f32 %v2810_v53, %v2747_v35  ;;  %v2624_v10 = vmul.f32 0.6931472, %v3889_v29  ;;  %v3522_v36 = vpop.f32.mrf.mxu0 }
 0x210   :  { %v2431_v30 = vadd.f32 1e-05, %v1939_v47  ;;  %v3670_v55 = vpop.f32.mrf.mxu1  ;;  %v2502_v18 = vmul.f32 %v3891_v56, %v2362_v31 }
 0x211   :  { %v2228_v8 = vand.u32 2147483647, %v2163_v60  ;;  %v2748_v5 = vmul.f32 %v2624_v10, %v2624_v10  ;;  %v5312_v0 = vpop.f32.mrf.mxu0  ;;  %3620 = vmatmul.mubr.bf16.gmra.mxu0 %v1410_v2  ;;  %3768 = vmatmul.mubr.bf16.gmra.mxu1 %v1852_v12 }
 0x212   :  { %3904 = vrcp.f32 %v2431_v30  ;;  %v1944_v37 = vpop.f32.mrf.mxu1  ;;  %v3893_v24 = vpop.eup %3892  ;;  %3623 = vmatprep.mubr.msk.bf16.mxu0 %vm4143_vm0, %v4142_v1  ;;  %3771 = vmatprep.mubr.msk.bf16.mxu1 %vm4143_vm0, %v4142_v1  ;;  %v2364_v1 = vadd.f32 1e-05, %v5287_v32  ;;  %v2367_v39 = vadd.f32 1e-05, %v5312_v0 }
 0x213   :  { %3906 = vlog2.f32 %v2502_v18  ;;  %v2292_v21 = vadd.f32 %v2291_v19, %v2228_v8  ;;  %v2164_v22 = vsub.f32 %v5312_v0, %v1944_v37  ;;  %v3895_v50 = vpop.eup %3894  ;;  %v2812_v41 = vadd.f32 %v2811_v7, %v2748_v5  ;;  %v3525_v46 = vpop.f32.mrf.mxu0 }
 0x214   :  { %v2626_v28 = vmul.f32 0.6931472, %v3893_v24  ;;  %v2432_v25 = vadd.f32 1e-05, %v1944_v37  ;;  %v3673_v49 = vpop.f32.mrf.mxu1  ;;  %v2504_v4 = vmul.f32 %v3895_v50, %v2363_v23 }
 0x215   :  { %v2229_v27 = vand.u32 2147483647, %v2164_v22  ;;  %v5322_v20 = vpop.f32.mrf.mxu0 }
 0x216   :  { %v2749_v34 = vmul.f32 %v2626_v28, %v2626_v28  ;;  %3908 = vrcp.f32 %v2432_v25  ;;  %v1947_v26 = vpop.f32.mrf.mxu1  ;;  %v3897_v45 = vpop.eup %3896  ;;  %v2368_v0 = vadd.f32 1e-05, %v5322_v20 }
 0x217   :  { %3910 = vlog2.f32 %v2504_v4  ;;  %v2293_v63 = vadd.f32 %v2292_v21, %v2229_v27  ;;  %v2165_v6 = vsub.f32 %v5322_v20, %v1947_v26  ;;  %v3899_v48 = vpop.eup %3898  ;;  %v2628_v17 = vmul.f32 0.6931472, %v3897_v45  ;;  %v3526_v57 = vpop.f32.mrf.mxu0 }
 0x218   :  { %v2813_v9 = vadd.f32 %v2812_v41, %v2749_v34  ;;  %v2433_v3 = vadd.f32 1e-05, %v1947_v26  ;;  %v3674_v52 = vpop.f32.mrf.mxu1  ;;  %v2506_v53 = vmul.f32 %v3899_v48, %v2364_v1 }
 0x219   :  { %v2230_v54 = vand.u32 2147483647, %v2165_v6  ;;  %v2750_v59 = vmul.f32 %v2628_v17, %v2628_v17  ;;  %v5327_v42 = vpop.f32.mrf.mxu0  ;;  %3624 = vmatmul.mubr.bf16.gmra.mxu0 %v1411_v13  ;;  %3772 = vmatmul.mubr.bf16.gmra.mxu1 %v1853_v61 }
 0x21a   :  { %3912 = vrcp.f32 %v2433_v3  ;;  %v1952_v32 = vpop.f32.mrf.mxu1  ;;  %v3901_v62 = vpop.eup %3900 }
 0x21b   :  { %3914 = vlog2.f32 %v2506_v53  ;;  %v2294_v11 = vadd.f32 %v2293_v63, %v2230_v54  ;;  %v2166_v15 = vsub.f32 %v5327_v42, %v1952_v32  ;;  %v3903_v14 = vpop.eup %3902  ;;  %v2814_v58 = vadd.f32 %v2813_v9, %v2750_v59  ;;  %v3529_v38 = vpop.f32.mrf.mxu0 }
 0x21c   :  { %v2508_v44 = vmul.f32 %v3901_v62, %v2365_v40  ;;  %v2434_v43 = vadd.f32 1e-05, %v1952_v32  ;;  %v3677_v2 = vpop.f32.mrf.mxu1  ;;  %v2630_v35 = vmul.f32 0.6931472, %v3903_v14  ;;  %v2369_v59 = vadd.f32 1e-05, %v5327_v42 }
 0x21d   :  { %v2231_v47 = vand.u32 2147483647, %v2166_v15  ;;  %v5331_v29 = vpop.f32.mrf.mxu0 }
 0x21e   :  { %3916 = vlog2.f32 %v2508_v44  ;;  %v1955_v31 = vpop.f32.mrf.mxu1  ;;  %v2751_v60 = vmul.f32 %v2630_v35, %v2630_v35  ;;  %v2370_v42 = vadd.f32 1e-05, %v5331_v29 }
 0x21f   :  { %v3905_v19 = vpop.eup %3904  ;;  %v2295_v56 = vadd.f32 %v2294_v11, %v2231_v47  ;;  %3918 = vrcp.f32 %v2434_v43  ;;  %v2167_v10 = vsub.f32 %v5331_v29, %v1955_v31  ;;  %v2435_v30 = vadd.f32 1e-05, %v1955_v31  ;;  %v3530_v36 = vpop.f32.mrf.mxu0 }
 0x220   :  { %v3907_v12 = vpop.eup %3906  ;;  %v2510_v7 = vmul.f32 %v3905_v19, %v2366_v33  ;;  %v3678_v55 = vpop.f32.mrf.mxu1  ;;  %v2815_v18 = vadd.f32 %v2814_v58, %v2751_v60 }
 0x221   :  { %v2632_v8 = vmul.f32 0.6931472, %v3907_v12  ;;  %v2232_v16 = vand.u32 2147483647, %v2167_v10  ;;  %v5335_v5 = vpop.f32.mrf.mxu0 }
 0x222   :  { %3920 = vlog2.f32 %v2510_v7  ;;  %v1960_v37 = vpop.f32.mrf.mxu1  ;;  %v2371_v29 = vadd.f32 1e-05, %v5335_v5 }
 0x223   :  { %v3909_v24 = vpop.eup %3908  ;;  %v2752_v23 = vmul.f32 %v2632_v8, %v2632_v8  ;;  %3922 = vrcp.f32 %v2435_v30  ;;  %v2168_v21 = vsub.f32 %v5335_v5, %v1960_v37  ;;  %v2296_v51 = vadd.f32 %v2295_v56, %v2232_v16  ;;  %v3533_v28 = vpop.f32.mrf.mxu0 }
 0x224   :  { %v3911_v22 = vpop.eup %3910  ;;  %v2512_v50 = vmul.f32 %v3909_v24, %v2367_v39  ;;  %v2436_v41 = vadd.f32 1e-05, %v1960_v37  ;;  %v3681_v25 = vpop.f32.mrf.mxu1 }
 0x225   :  { %v2816_v46 = vadd.f32 %v2815_v18, %v2752_v23  ;;  %v2634_v49 = vmul.f32 0.6931472, %v3911_v22  ;;  %v2233_v4 = vand.u32 2147483647, %v2168_v21  ;;  %v5339_v27 = vpop.f32.mrf.mxu0 }
 0x226   :  { %3924 = vlog2.f32 %v2512_v50  ;;  %v1963_v13 = vpop.f32.mrf.mxu1  ;;  %v2372_v5 = vadd.f32 1e-05, %v5339_v27 }
 0x227   :  { %v3913_v34 = vpop.eup %3912  ;;  %v2753_v26 = vmul.f32 %v2634_v49, %v2634_v49  ;;  %v2297_v45 = vadd.f32 %v2296_v51, %v2233_v4  ;;  %3926 = vrcp.f32 %v2436_v41  ;;  %v2169_v6 = vsub.f32 %v5339_v27, %v1963_v13  ;;  %v3534_v61 = vpop.f32.mrf.mxu0 }
 0x228   :  { %v3915_v1 = vpop.eup %3914  ;;  %v2514_v63 = vmul.f32 %v3913_v34, %v2368_v0  ;;  %v2437_v48 = vadd.f32 1e-05, %v1963_v13  ;;  %v3682_v9 = vpop.f32.mrf.mxu1 }
 0x229   :  { %v2817_v17 = vadd.f32 %v2816_v46, %v2753_v26  ;;  %v2636_v3 = vmul.f32 0.6931472, %v3915_v1  ;;  %v2234_v57 = vand.u32 2147483647, %v2169_v6  ;;  %v5342_v52 = vpop.f32.mrf.mxu0 }
 0x22a   :  { %3928 = vlog2.f32 %v2514_v63  ;;  %v1968_v20 = vpop.f32.mrf.mxu1 }
 0x22b   :  { %v3917_v53 = vpop.eup %3916  ;;  %v2754_v54 = vmul.f32 %v2636_v3, %v2636_v3  ;;  %3930 = vrcp.f32 %v2437_v48  ;;  %v2170_v40 = vsub.f32 %v5342_v52, %v1968_v20  ;;  %v2298_v11 = vadd.f32 %v2297_v45, %v2234_v57  ;;  %v3537_v14 = vpop.f32.mrf.mxu0 }
 0x22c   :  { %v3919_v32 = vpop.eup %3918  ;;  %v2638_v62 = vmul.f32 0.6931472, %v3917_v53  ;;  %v2438_v15 = vadd.f32 1e-05, %v1968_v20  ;;  %v3685_v58 = vpop.f32.mrf.mxu1  ;;  %v2373_v3 = vadd.f32 1e-05, %v5342_v52 }
 0x22d   :  { %v2818_v44 = vadd.f32 %v2817_v17, %v2754_v54  ;;  %v2516_v43 = vmul.f32 %v3919_v32, %v2369_v59  ;;  %v2235_v38 = vand.u32 2147483647, %v2170_v40  ;;  %v5346_v35 = vpop.f32.mrf.mxu0 }
 0x22e   :  { %v2755_v2 = vmul.f32 %v2638_v62, %v2638_v62  ;;  %3932 = vrcp.f32 %v2438_v15  ;;  %v1971_v47 = vpop.f32.mrf.mxu1  ;;  %v2374_v52 = vadd.f32 1e-05, %v5346_v35 }
 0x22f   :  { %v3921_v33 = vpop.eup %3920  ;;  %3934 = vlog2.f32 %v2516_v43  ;;  %v2299_v31 = vadd.f32 %v2298_v11, %v2235_v38  ;;  %v2171_v19 = vsub.f32 %v5346_v35, %v1971_v47  ;;  %v2439_v7 = vadd.f32 1e-05, %v1971_v47  ;;  %v3538_v10 = vpop.f32.mrf.mxu0 }
 0x230   :  { %v3923_v60 = vpop.eup %3922  ;;  %v2819_v56 = vadd.f32 %v2818_v44, %v2755_v2  ;;  %v2640_v12 = vmul.f32 0.6931472, %v3921_v33  ;;  %v3686_v30 = vpop.f32.mrf.mxu1 }
 0x231   :  { %v2518_v36 = vmul.f32 %v3923_v60, %v2370_v42  ;;  %v2236_v55 = vand.u32 2147483647, %v2171_v19  ;;  %3936 = vrcp.f32 %v2439_v7  ;;  %v5350_v8 = vpop.f32.mrf.mxu0 }
 0x232   :  { %v2756_v18 = vmul.f32 %v2640_v12, %v2640_v12  ;;  %v1976_v39 = vpop.f32.mrf.mxu1  ;;  %v2375_v10 = vadd.f32 1e-05, %v5350_v8 }
 0x233   :  { %v3925_v16 = vpop.eup %3924  ;;  %3938 = vlog2.f32 %v2518_v36  ;;  %v2300_v37 = vadd.f32 %v2299_v31, %v2236_v55  ;;  %v2172_v24 = vsub.f32 %v5350_v8, %v1976_v39  ;;  %v2440_v50 = vadd.f32 1e-05, %v1976_v39  ;;  %v3541_v51 = vpop.f32.mrf.mxu0 }
 0x234   :  { %v3927_v23 = vpop.eup %3926  ;;  %v2820_v21 = vadd.f32 %v2819_v56, %v2756_v18  ;;  %v2642_v22 = vmul.f32 0.6931472, %v3925_v16  ;;  %v3689_v41 = vpop.f32.mrf.mxu1 }
 0x235   :  { %v2520_v28 = vmul.f32 %v3927_v23, %v2371_v29  ;;  %v2237_v25 = vand.u32 2147483647, %v2172_v24  ;;  %3940 = vrcp.f32 %v2440_v50  ;;  %v5354_v49 = vpop.f32.mrf.mxu0 }
 0x236   :  { %v2757_v46 = vmul.f32 %v2642_v22, %v2642_v22  ;;  %v1979_v4 = vpop.f32.mrf.mxu1  ;;  %v2376_v8 = vadd.f32 1e-05, %v5354_v49 }
 0x237   :  { %v3929_v0 = vpop.eup %3928  ;;  %3942 = vlog2.f32 %v2520_v28  ;;  %v2301_v13 = vadd.f32 %v2300_v37, %v2237_v25  ;;  %v2173_v34 = vsub.f32 %v5354_v49, %v1979_v4  ;;  %v2441_v63 = vadd.f32 1e-05, %v1979_v4  ;;  %v3542_v6 = vpop.f32.mrf.mxu0 }
 0x238   :  { %v3931_v26 = vpop.eup %3930  ;;  %v2821_v45 = vadd.f32 %v2820_v21, %v2757_v46  ;;  %v2644_v1 = vmul.f32 0.6931472, %v3929_v0  ;;  %v3690_v48 = vpop.f32.mrf.mxu1 }
 0x239   :  { %v2522_v61 = vmul.f32 %v3931_v26, %v2372_v5  ;;  %v2238_v9 = vand.u32 2147483647, %v2173_v34  ;;  %3944 = vrcp.f32 %v2441_v63  ;;  %v5359_v57 = vpop.f32.mrf.mxu0 }
 0x23a   :  { %v2758_v17 = vmul.f32 %v2644_v1, %v2644_v1  ;;  %v1984_v20 = vpop.f32.mrf.mxu1 }
 0x23b   :  { %v3933_v53 = vpop.eup %3932  ;;  %3946 = vlog2.f32 %v2522_v61  ;;  %v2302_v27 = vadd.f32 %v2301_v13, %v2238_v9  ;;  %v2174_v54 = vsub.f32 %v5359_v57, %v1984_v20  ;;  %v2442_v62 = vadd.f32 1e-05, %v1984_v20  ;;  %v3545_v11 = vpop.f32.mrf.mxu0 }
 0x23c   :  { %v3935_v59 = vpop.eup %3934  ;;  %v2822_v40 = vadd.f32 %v2821_v45, %v2758_v17  ;;  %v2524_v32 = vmul.f32 %v3933_v53, %v2373_v3  ;;  %v3693_v15 = vpop.f32.mrf.mxu1  ;;  %v2377_v17 = vadd.f32 1e-05, %v5359_v57 }
 0x23d   :  { %v2646_v14 = vmul.f32 0.6931472, %v3935_v59  ;;  %v2239_v58 = vand.u32 2147483647, %v2174_v54  ;;  %v5363_v44 = vpop.f32.mrf.mxu0 }
 0x23e   :  { %3948 = vlog2.f32 %v2524_v32  ;;  %v1987_v43 = vpop.f32.mrf.mxu1  ;;  %v3937_v38 = vpop.eup %3936  ;;  %v2378_v57 = vadd.f32 1e-05, %v5363_v44 }
 0x23f   :  { %v2759_v2 = vmul.f32 %v2646_v14, %v2646_v14  ;;  %v2303_v47 = vadd.f32 %v2302_v27, %v2239_v58  ;;  %3950 = vrcp.f32 %v2442_v62  ;;  %v2526_v42 = vmul.f32 %v3937_v38, %v2374_v52  ;;  %v3546_v60 = vpop.f32.mrf.mxu0 }
 0x240   :  { %v3939_v33 = vpop.eup %3938  ;;  %v2175_v31 = vsub.f32 %v5363_v44, %v1987_v43  ;;  %v2443_v19 = vadd.f32 1e-05, %v1987_v43  ;;  %v3694_v56 = vpop.f32.mrf.mxu1 }
 0x241   :  { %v2823_v12 = vadd.f32 %v2822_v40, %v2759_v2  ;;  %v2648_v7 = vmul.f32 0.6931472, %v3939_v33  ;;  %3952 = vlog2.f32 %v2526_v42  ;;  %v5367_v30 = vpop.f32.mrf.mxu0 }
 0x242   :  { %v2240_v35 = vand.u32 2147483647, %v2175_v31  ;;  %v1992_v36 = vpop.f32.mrf.mxu1  ;;  %v3941_v55 = vpop.eup %3940  ;;  %3954 = vrcp.f32 %v2443_v19  ;;  %v2379_v44 = vadd.f32 1e-05, %v5367_v30 }
 0x243   :  { %v2760_v18 = vmul.f32 %v2648_v7, %v2648_v7  ;;  %v2176_v39 = vsub.f32 %v5367_v30, %v1992_v36  ;;  %v2528_v29 = vmul.f32 %v3941_v55, %v2375_v10  ;;  %v2444_v24 = vadd.f32 1e-05, %v1992_v36  ;;  %v3549_v23 = vpop.f32.mrf.mxu0 }
 0x244   :  { %v3943_v16 = vpop.eup %3942  ;;  %v2304_v37 = vadd.f32 %v2303_v47, %v2240_v35  ;;  %v3697_v21 = vpop.f32.mrf.mxu1 }
 0x245   :  { %v2824_v22 = vadd.f32 %v2823_v12, %v2760_v18  ;;  %v2650_v50 = vmul.f32 0.6931472, %v3943_v16  ;;  %v2241_v51 = vand.u32 2147483647, %v2176_v39  ;;  %3956 = vlog2.f32 %v2528_v29  ;;  %v5371_v41 = vpop.f32.mrf.mxu0 }
 0x246   :  { %v1995_v28 = vpop.f32.mrf.mxu1  ;;  %v3945_v25 = vpop.eup %3944  ;;  %3958 = vrcp.f32 %v2444_v24 }
 0x247   :  { %v2761_v46 = vmul.f32 %v2650_v50, %v2650_v50  ;;  %v2305_v4 = vadd.f32 %v2304_v37, %v2241_v51  ;;  %v2530_v5 = vmul.f32 %v3945_v25, %v2376_v8  ;;  %v2177_v13 = vsub.f32 %v5371_v41, %v1995_v28  ;;  %v3550_v26 = vpop.f32.mrf.mxu0 }
 0x248   :  { %v3947_v0 = vpop.eup %3946  ;;  %v2445_v34 = vadd.f32 1e-05, %v1995_v28  ;;  %v3698_v45 = vpop.f32.mrf.mxu1  ;;  %v2380_v28 = vadd.f32 1e-05, %v5371_v41 }
 0x249   :  { %v2825_v1 = vadd.f32 %v2824_v22, %v2761_v46  ;;  %v2652_v63 = vmul.f32 0.6931472, %v3947_v0  ;;  %3960 = vlog2.f32 %v2530_v5  ;;  %v2242_v6 = vand.u32 2147483647, %v2177_v13  ;;  %v5374_v48 = vpop.f32.mrf.mxu0 }
 0x24a   :  { %v2000_v49 = vpop.f32.mrf.mxu1  ;;  %3962 = vrcp.f32 %v2445_v34 }
 0x24b   :  { %v3949_v61 = vpop.eup %3948  ;;  %v2762_v9 = vmul.f32 %v2652_v63, %v2652_v63  ;;  %v2178_v3 = vsub.f32 %v5374_v48, %v2000_v49  ;;  %v2306_v27 = vadd.f32 %v2305_v4, %v2242_v6  ;;  %v2446_v54 = vadd.f32 1e-05, %v2000_v49  ;;  %v3553_v59 = vpop.f32.mrf.mxu0 }
 0x24c   :  { %v3951_v20 = vpop.eup %3950  ;;  %v2654_v53 = vmul.f32 0.6931472, %v3949_v61  ;;  %v3701_v40 = vpop.f32.mrf.mxu1  ;;  %v2381_v63 = vadd.f32 1e-05, %v5374_v48 }
 0x24d   :  { %v2826_v32 = vadd.f32 %v2825_v1, %v2762_v9  ;;  %v2532_v62 = vmul.f32 %v3951_v20, %v2377_v17  ;;  %v2243_v11 = vand.u32 2147483647, %v2178_v3  ;;  %3964 = vrcp.f32 %v2446_v54  ;;  %v5378_v14 = vpop.f32.mrf.mxu0 }
 0x24e   :  { %v2763_v15 = vmul.f32 %v2654_v53, %v2654_v53  ;;  %v2003_v58 = vpop.f32.mrf.mxu1  ;;  %v3953_v52 = vpop.eup %3952 }
 0x24f   :  { %3966 = vlog2.f32 %v2532_v62  ;;  %v2307_v43 = vadd.f32 %v2306_v27, %v2243_v11  ;;  %v2179_v38 = vsub.f32 %v5378_v14, %v2003_v58  ;;  %v3955_v2 = vpop.eup %3954  ;;  %v2656_v33 = vmul.f32 0.6931472, %v3953_v52  ;;  %v3554_v31 = vpop.f32.mrf.mxu0 }
 0x250   :  { %v2827_v47 = vadd.f32 %v2826_v32, %v2763_v15  ;;  %v2447_v42 = vadd.f32 1e-05, %v2003_v58  ;;  %v3702_v19 = vpop.f32.mrf.mxu1  ;;  %v2534_v60 = vmul.f32 %v3955_v2, %v2378_v57  ;;  %v2382_v32 = vadd.f32 1e-05, %v5378_v14 }
 0x251   :  { %v2244_v56 = vand.u32 2147483647, %v2179_v38  ;;  %v2764_v12 = vmul.f32 %v2656_v33, %v2656_v33  ;;  %v5382_v7 = vpop.f32.mrf.mxu0 }
 0x252   :  { %3968 = vrcp.f32 %v2447_v42  ;;  %v2008_v10 = vpop.f32.mrf.mxu1  ;;  %v3957_v35 = vpop.eup %3956  ;;  %v2383_v14 = vadd.f32 1e-05, %v5382_v7 }
 0x253   :  { %3970 = vlog2.f32 %v2534_v60  ;;  %v2308_v36 = vadd.f32 %v2307_v43, %v2244_v56  ;;  %v2180_v55 = vsub.f32 %v5382_v7, %v2008_v10  ;;  %v3959_v18 = vpop.eup %3958  ;;  %v2828_v39 = vadd.f32 %v2827_v47, %v2764_v12  ;;  %v3557_v37 = vpop.f32.mrf.mxu0 }
 0x254   :  { %v2658_v16 = vmul.f32 0.6931472, %v3957_v35  ;;  %v2448_v29 = vadd.f32 1e-05, %v2008_v10  ;;  %v3705_v24 = vpop.f32.mrf.mxu1  ;;  %v2536_v23 = vmul.f32 %v3959_v18, %v2379_v44 }
 0x255   :  { %v2245_v21 = vand.u32 2147483647, %v2180_v55  ;;  %v1617_v50 = vpop.f32.mrf.mxu0 }
 0x256   :  { %v2765_v22 = vmul.f32 %v2658_v16, %v2658_v16  ;;  %3972 = vrcp.f32 %v2448_v29  ;;  %v2011_v51 = vpop.f32.mrf.mxu1  ;;  %v3961_v8 = vpop.eup %3960  ;;  %v2384_v18 = vadd.f32 1e-05, %v1617_v50 }
 0x257   :  { %3974 = vlog2.f32 %v2536_v23  ;;  %v2309_v30 = vadd.f32 %v2308_v36, %v2245_v21  ;;  %v2181_v25 = vsub.f32 %v1617_v50, %v2011_v51  ;;  %v3963_v46 = vpop.eup %3962  ;;  %v2660_v0 = vmul.f32 0.6931472, %v3961_v8  ;;  %v3558_v13 = vpop.f32.mrf.mxu0 }
 0x258   :  { %v2829_v4 = vadd.f32 %v2828_v39, %v2765_v22  ;;  %v2449_v5 = vadd.f32 1e-05, %v2011_v51  ;;  %v3706_v34 = vpop.f32.mrf.mxu1  ;;  %v2538_v26 = vmul.f32 %v3963_v46, %v2380_v28 }
 0x259   :  { %v2246_v45 = vand.u32 2147483647, %v2181_v25  ;;  %v2766_v1 = vmul.f32 %v2660_v0, %v2660_v0  ;;  %v1622_v6 = vpop.f32.mrf.mxu0 }
 0x25a   :  { %3976 = vrcp.f32 %v2449_v5  ;;  %v2016_v49 = vpop.f32.mrf.mxu1  ;;  %v3965_v61 = vpop.eup %3964  ;;  %v2385_v46 = vadd.f32 1e-05, %v1622_v6 }
 0x25b   :  { %3978 = vlog2.f32 %v2538_v26  ;;  %v2310_v9 = vadd.f32 %v2309_v30, %v2246_v45  ;;  %v2182_v41 = vsub.f32 %v1622_v6, %v2016_v49  ;;  %v2830_v3 = vadd.f32 %v2829_v4, %v2766_v1  ;;  %v3561_v27 = vpop.f32.mrf.mxu0 }
 0x25c   :  { %v3967_v17 = vpop.eup %3966  ;;  %v2540_v20 = vmul.f32 %v3965_v61, %v2381_v63  ;;  %v2450_v53 = vadd.f32 1e-05, %v2016_v49  ;;  %v3709_v54 = vpop.f32.mrf.mxu1 }
 0x25d   :  { %v2662_v59 = vmul.f32 0.6931472, %v3967_v17  ;;  %v2247_v40 = vand.u32 2147483647, %v2182_v41  ;;  %v5389_v62 = vpop.f32.mrf.mxu0 }
 0x25e   :  { %3980 = vlog2.f32 %v2540_v20  ;;  %v5391_v48 = vpop.f32.mrf.mxu1 }
 0x25f   :  { %v3969_v11 = vpop.eup %3968  ;;  %v2767_v15 = vmul.f32 %v2662_v59, %v2662_v59  ;;  %v5393_v58 = vadd.f32 %v2310_v9, %v2247_v40  ;;  %3982 = vrcp.f32 %v2450_v53  ;;  %v2451_v43 = vadd.f32 1e-05, %v5391_v48  ;;  %v3562_v38 = vpop.f32.mrf.mxu0 }
 0x260   :  { %v3971_v52 = vpop.eup %3970  ;;  %v2542_v57 = vmul.f32 %v3969_v11, %v2382_v32  ;;  %v3710_v2 = vpop.f32.mrf.mxu1  ;;  %v2386_v9 = vadd.f32 1e-05, %v5389_v62 }
 0x261   :  { %v2831_v47 = vadd.f32 %v2830_v3, %v2767_v15  ;;  %v2664_v33 = vmul.f32 0.6931472, %v3971_v52  ;;  %v5397_v42 = vpop.f32.mrf.mxu0 }
 0x262   :  { %3984 = vlog2.f32 %v2542_v57  ;;  %v5399_v31 = vpop.f32.mrf.mxu1  ;;  %v2387_v11 = vadd.f32 1e-05, %v5397_v42 }
 0x263   :  { %v3973_v19 = vpop.eup %3972  ;;  %v2768_v60 = vmul.f32 %v2664_v33, %v2664_v33  ;;  %3986 = vrcp.f32 %v2451_v43  ;;  %v2452_v10 = vadd.f32 1e-05, %v5399_v31  ;;  %v3565_v35 = vpop.f32.mrf.mxu0 }
 0x264   :  { %v3975_v56 = vpop.eup %3974  ;;  %v2544_v12 = vmul.f32 %v3973_v19, %v2383_v14  ;;  %v3713_v44 = vpop.f32.mrf.mxu1 }
 0x265   :  { %v2832_v36 = vadd.f32 %v2831_v47, %v2768_v60  ;;  %v2666_v55 = vmul.f32 0.6931472, %v3975_v56  ;;  %v5402_v39 = vpop.f32.mrf.mxu0 }
 0x266   :  { %3988 = vlog2.f32 %v2544_v12  ;;  %v5404_v7 = vpop.f32.mrf.mxu1  ;;  %v2388_v56 = vadd.f32 1e-05, %v5402_v39 }
 0x267   :  { %v3977_v16 = vpop.eup %3976  ;;  %v2769_v29 = vmul.f32 %v2666_v55, %v2666_v55  ;;  %3990 = vrcp.f32 %v2452_v10  ;;  %v2453_v23 = vadd.f32 1e-05, %v5404_v7  ;;  %v3566_v21 = vpop.f32.mrf.mxu0 }
 0x268   :  { %v3979_v37 = vpop.eup %3978  ;;  %v2546_v24 = vmul.f32 %v3977_v16, %v2384_v18  ;;  %v3714_v22 = vpop.f32.mrf.mxu1 }
 0x269   :  { %v2833_v51 = vadd.f32 %v2832_v36, %v2769_v29  ;;  %v2668_v8 = vmul.f32 0.6931472, %v3979_v37  ;;  %v5407_v28 = vpop.f32.mrf.mxu0 }
 0x26a   :  { %3992 = vlog2.f32 %v2546_v24  ;;  %v5409_v30 = vpop.f32.mrf.mxu1  ;;  %v2389_v29 = vadd.f32 1e-05, %v5407_v28 }
 0x26b   :  { %v3981_v50 = vpop.eup %3980  ;;  %v2770_v25 = vmul.f32 %v2668_v8, %v2668_v8  ;;  %3994 = vrcp.f32 %v2453_v23  ;;  %v2454_v5 = vadd.f32 1e-05, %v5409_v30  ;;  %v3569_v13 = vpop.f32.mrf.mxu0 }
 0x26c   :  { %v3983_v4 = vpop.eup %3982  ;;  %v2670_v0 = vmul.f32 0.6931472, %v3981_v50  ;;  %v3717_v34 = vpop.f32.mrf.mxu1 }
 0x26d   :  { %v2834_v26 = vadd.f32 %v2833_v51, %v2770_v25  ;;  %v2548_v45 = vmul.f32 %v3983_v4, %v2385_v46  ;;  %3996 = vrcp.f32 %v2454_v5  ;;  %v5412_v63 = vpop.f32.mrf.mxu0 }
 0x26e   :  { %v2771_v1 = vmul.f32 %v2670_v0, %v2670_v0  ;;  %v5414_v49 = vpop.f32.mrf.mxu1  ;;  %v2390_v46 = vadd.f32 1e-05, %v5412_v63 }
 0x26f   :  { %v3985_v61 = vpop.eup %3984  ;;  %3998 = vlog2.f32 %v2548_v45  ;;  %v2455_v3 = vadd.f32 1e-05, %v5414_v49  ;;  %v3570_v20 = vpop.f32.mrf.mxu0 }
 0x270   :  { %v3987_v6 = vpop.eup %3986  ;;  %v2835_v41 = vadd.f32 %v2834_v26, %v2771_v1  ;;  %v2672_v17 = vmul.f32 0.6931472, %v3985_v61  ;;  %v3718_v53 = vpop.f32.mrf.mxu1 }
 0x271   :  { %v2550_v27 = vmul.f32 %v3987_v6, %v2386_v9  ;;  %4000 = vrcp.f32 %v2455_v3  ;;  %v5418_v59 = vpop.f32.mrf.mxu0 }
 0x272   :  { %v2772_v54 = vmul.f32 %v2672_v17, %v2672_v17  ;;  %v5420_v40 = vpop.f32.mrf.mxu1  ;;  %v2391_v6 = vadd.f32 1e-05, %v5418_v59 }
 0x273   :  { %v3989_v32 = vpop.eup %3988  ;;  %4002 = vlog2.f32 %v2550_v27  ;;  %v2456_v43 = vadd.f32 1e-05, %v5420_v40  ;;  %v3573_v38 = vpop.f32.mrf.mxu0 }
 0x274   :  { %v3991_v15 = vpop.eup %3990  ;;  %v2836_v52 = vadd.f32 %v2835_v41, %v2772_v54  ;;  %v2674_v57 = vmul.f32 0.6931472, %v3989_v32  ;;  %v3721_v2 = vpop.f32.mrf.mxu1 }
 0x275   :  { %v2552_v47 = vmul.f32 %v3991_v15, %v2387_v11  ;;  %4004 = vrcp.f32 %v2456_v43  ;;  %v5424_v14 = vpop.f32.mrf.mxu0 }
 0x276   :  { %v2773_v33 = vmul.f32 %v2674_v57, %v2674_v57  ;;  %v5426_v19 = vpop.f32.mrf.mxu1 }
 0x277   :  { %v3993_v60 = vpop.eup %3992  ;;  %4006 = vlog2.f32 %v2552_v47  ;;  %v2457_v44 = vadd.f32 1e-05, %v5426_v19  ;;  %v3574_v36 = vpop.f32.mrf.mxu0 }
 0x278   :  { %v3995_v12 = vpop.eup %3994  ;;  %v2837_v10 = vadd.f32 %v2836_v52, %v2773_v33  ;;  %v2676_v35 = vmul.f32 0.6931472, %v3993_v60  ;;  %v3722_v55 = vpop.f32.mrf.mxu1  ;;  %v2392_v52 = vadd.f32 1e-05, %v5424_v14 }
 0x279   :  { %v2554_v18 = vmul.f32 %v3995_v12, %v2388_v56  ;;  %4008 = vrcp.f32 %v2457_v44  ;;  %v5431_v37 = vpop.f32.mrf.mxu0 }
 0x27a   :  { %v2774_v16 = vmul.f32 %v2676_v35, %v2676_v35  ;;  %v5433_v24 = vpop.f32.mrf.mxu1  ;;  %v3997_v23 = vpop.eup %3996 }
 0x27b   :  { %4010 = vlog2.f32 %v2554_v18  ;;  %v2556_v51 = vmul.f32 %v3997_v23, %v2389_v29  ;;  %v3577_v8 = vpop.f32.mrf.mxu0 }
 0x27c   :  { %v3999_v21 = vpop.eup %3998  ;;  %v2838_v22 = vadd.f32 %v2837_v10, %v2774_v16  ;;  %v3725_v50 = vpop.f32.mrf.mxu1 }
 0x27d   :  { %v2678_v25 = vmul.f32 0.6931472, %v3999_v21  ;;  %4012 = vlog2.f32 %v2556_v51  ;;  %v5436_v4 = vpop.f32.mrf.mxu0 }
 0x27e   :  { %v5438_v0 = vpop.f32.mrf.mxu1  ;;  %v4001_v5 = vpop.eup %4000 }
 0x27f   :  { %v2775_v13 = vmul.f32 %v2678_v25, %v2678_v25  ;;  %v2558_v26 = vmul.f32 %v4001_v5, %v2390_v46  ;;  %v3578_v45 = vpop.f32.mrf.mxu0  ;;  %v2459_v5 = vadd.f32 1e-05, %v5438_v0 }
 0x280   :  { %v4003_v34 = vpop.eup %4002  ;;  %v3726_v1 = vpop.f32.mrf.mxu1 }
 0x281   :  { %v2839_v61 = vadd.f32 %v2838_v22, %v2775_v13  ;;  %v2680_v9 = vmul.f32 0.6931472, %v4003_v34  ;;  %4014 = vlog2.f32 %v2558_v26  ;;  %v5441_v41 = vpop.f32.mrf.mxu0  ;;  %v2458_v22 = vadd.f32 1e-05, %v5433_v24 }
 0x282   :  { %v5443_v17 = vpop.f32.mrf.mxu1  ;;  %v4005_v3 = vpop.eup %4004 }
 0x283   :  { %v2776_v20 = vmul.f32 %v2680_v9, %v2680_v9  ;;  %v2560_v27 = vmul.f32 %v4005_v3, %v2391_v6  ;;  %v3581_v54 = vpop.f32.mrf.mxu0  ;;  %v2183_v9 = vsub.f32 %v5389_v62, %v5391_v48 }
 0x284   :  { %v4007_v53 = vpop.eup %4006  ;;  %v3729_v32 = vpop.f32.mrf.mxu1  ;;  %v2184_v54 = vsub.f32 %v5397_v42, %v5399_v31  ;;  %v2186_v31 = vsub.f32 %v5407_v28, %v5409_v30  ;;  %v2188_v28 = vsub.f32 %v5418_v59, %v5420_v40  ;;  %v2393_v30 = vadd.f32 1e-05, %v5431_v37 }
 0x285   :  { %v2840_v11 = vadd.f32 %v2839_v61, %v2776_v20  ;;  %v2682_v15 = vmul.f32 0.6931472, %v4007_v53  ;;  %4016 = vlog2.f32 %v2560_v27  ;;  %v5446_v57 = vpop.f32.mrf.mxu0  ;;  %v2460_v20 = vadd.f32 1e-05, %v5443_v17 }
 0x286   :  { %v5448_v43 = vpop.f32.mrf.mxu1  ;;  %v4009_v38 = vpop.eup %4008 }
 0x287   :  { %v2777_v2 = vmul.f32 %v2682_v15, %v2682_v15  ;;  %v2562_v33 = vmul.f32 %v4009_v38, %v2392_v52  ;;  %v3582_v60 = vpop.f32.mrf.mxu0  ;;  %v2248_v38 = vand.u32 2147483647, %v2183_v9 }
 0x288   :  { %v4011_v47 = vpop.eup %4010  ;;  %v3730_v56 = vpop.f32.mrf.mxu1  ;;  %v2249_v60 = vand.u32 2147483647, %v2184_v54 }
 0x289   :  { %v2841_v12 = vadd.f32 %v2840_v11, %v2777_v2  ;;  %v2684_v10 = vmul.f32 0.6931472, %v4011_v47  ;;  %4018 = vlog2.f32 %v2562_v33  ;;  %v5450_v35 = vpop.f32.mrf.mxu0  ;;  %v2185_v33 = vsub.f32 %v5402_v39, %v5404_v7 }
 0x28a   :  { %v5452_v44 = vpop.f32.mrf.mxu1  ;;  %v4013_v36 = vpop.eup %4012  ;;  %4020 = vrcp.f32 %v2458_v22  ;;  %v2187_v39 = vsub.f32 %v5412_v63, %v5414_v49 }
 0x28b   :  { %v2778_v55 = vmul.f32 %v2684_v10, %v2684_v10  ;;  %v2686_v18 = vmul.f32 0.6931472, %v4013_v36  ;;  %v3585_v16 = vpop.f32.mrf.mxu0  ;;  %4022 = vrcp.f32 %v2459_v5  ;;  %v2461_v10 = vadd.f32 1e-05, %v5448_v43 }
 0x28c   :  { %v3733_v29 = vpop.f32.mrf.mxu1  ;;  %4024 = vrcp.f32 %v2460_v20  ;;  %v2312_v36 = vadd.f32 %v5393_v58, %v2248_v38  ;;  %v2462_v58 = vadd.f32 1e-05, %v5452_v44  ;;  %v2395_v38 = vadd.f32 1e-05, %v5441_v41 }
 0x28d   :  { %v2842_v23 = vadd.f32 %v2841_v12, %v2778_v55  ;;  %v2779_v21 = vmul.f32 %v2686_v18, %v2686_v18  ;;  %v5455_v51 = vpop.f32.mrf.mxu0  ;;  %v2250_v29 = vand.u32 2147483647, %v2185_v33  ;;  %4026 = vrcp.f32 %v2461_v10 }
 0x28e   :  { %v5457_v8 = vpop.f32.mrf.mxu1  ;;  %v4015_v50 = vpop.eup %4014  ;;  %v2313_v7 = vadd.f32 %v2312_v36, %v2249_v60  ;;  %4028 = vrcp.f32 %v2462_v58 }
 0x28f   :  { %v2843_v25 = vadd.f32 %v2842_v23, %v2779_v21  ;;  %v2688_v46 = vmul.f32 0.6931472, %v4015_v50  ;;  %v3586_v13 = vpop.f32.mrf.mxu0  ;;  %v2251_v50 = vand.u32 2147483647, %v2186_v31  ;;  %v2193_v31 = vsub.f32 %v5446_v57, %v5448_v43 }
 0x290   :  { %v3734_v34 = vpop.f32.mrf.mxu1  ;;  %v2314_v49 = vadd.f32 %v2313_v7, %v2250_v29  ;;  %v2252_v13 = vand.u32 2147483647, %v2187_v39 }
 0x291   :  { %v2780_v26 = vmul.f32 %v2688_v46, %v2688_v46  ;;  %v5460_v45 = vpop.f32.mrf.mxu0  ;;  %v2189_v34 = vsub.f32 %v5424_v14, %v5426_v19  ;;  %v2191_v19 = vsub.f32 %v5436_v4, %v5438_v0 }
 0x292   :  { %v5462_v1 = vpop.f32.mrf.mxu1  ;;  %v4017_v61 = vpop.eup %4016  ;;  %v2315_v40 = vadd.f32 %v2314_v49, %v2251_v50  ;;  %v2258_v50 = vand.u32 2147483647, %v2193_v31 }
 0x293   :  { %v2844_v6 = vadd.f32 %v2843_v25, %v2780_v26  ;;  %v2690_v3 = vmul.f32 0.6931472, %v4017_v61  ;;  %v3589_v53 = vpop.f32.mrf.mxu0  ;;  %v2463_v25 = vadd.f32 1e-05, %v5457_v8  ;;  %v2394_v61 = vadd.f32 1e-05, %v5436_v4 }
 0x294   :  { %v3737_v27 = vpop.f32.mrf.mxu1  ;;  %v2254_v14 = vand.u32 2147483647, %v2189_v34 }
 0x295   :  { %v2781_v32 = vmul.f32 %v2690_v3, %v2690_v3  ;;  %v5469_v11 = vpop.f32.mrf.mxu0  ;;  %v2190_v3 = vsub.f32 %v5431_v37, %v5433_v24  ;;  %4030 = vrcp.f32 %v2463_v25 }
 0x296   :  { %v5471_v15 = vpop.f32.mrf.mxu1  ;;  %v4019_v52 = vpop.eup %4018 }
 0x297   :  { %v2845_v2 = vadd.f32 %v2844_v6, %v2781_v32  ;;  %v2692_v47 = vmul.f32 0.6931472, %v4019_v52  ;;  %v3590_v62 = vpop.f32.mrf.mxu0  ;;  %v4021_v22 = vpop.eup %4020  ;;  %v2253_v6 = vand.u32 2147483647, %v2188_v28  ;;  %v2316_v32 = vadd.f32 %v2315_v40, %v2252_v13 }
 0x298   :  { %v3738_v48 = vpop.f32.mrf.mxu1  ;;  %v4023_v63 = vpop.eup %4022  ;;  %v2564_v26 = vmul.f32 %v4021_v22, %v2393_v30  ;;  %v2464_v52 = vadd.f32 1e-05, %v5462_v1  ;;  %v2255_v62 = vand.u32 2147483647, %v2190_v3  ;;  %v2396_v22 = vadd.f32 1e-05, %v5446_v57 }
 0x299   :  { %v2782_v56 = vmul.f32 %v2692_v47, %v2692_v47  ;;  %v5475_v12 = vpop.f32.mrf.mxu0  ;;  %v2566_v20 = vmul.f32 %v4023_v63, %v2394_v61  ;;  %v4025_v54 = vpop.eup %4024  ;;  %v2317_v24 = vadd.f32 %v2316_v32, %v2253_v6  ;;  %v2192_v48 = vsub.f32 %v5441_v41, %v5443_v17 }
 0x29a   :  { %v5477_v42 = vpop.f32.mrf.mxu1  ;;  %4032 = vlog2.f32 %v2564_v26  ;;  %v2568_v33 = vmul.f32 %v4025_v54, %v2395_v38  ;;  %v4027_v29 = vpop.eup %4026  ;;  %v2194_v41 = vsub.f32 %v5450_v35, %v5452_v44  ;;  %v2195_v28 = vsub.f32 %v5455_v51, %v5457_v8 }
 0x29b   :  { %v5483_v55 = vadd.f32 %v2845_v2, %v2782_v56  ;;  %v3593_v18 = vpop.f32.mrf.mxu0  ;;  %v2465_v2 = vadd.f32 1e-05, %v5471_v15  ;;  %4034 = vlog2.f32 %v2566_v20  ;;  %v2318_v0 = vadd.f32 %v2317_v24, %v2254_v14  ;;  %v4029_v44 = vpop.eup %4028 }
 0x29c   :  { %v3741_v16 = vpop.f32.mrf.mxu1  ;;  %v2256_v56 = vand.u32 2147483647, %v2191_v19  ;;  %4036 = vrcp.f32 %v2464_v52  ;;  %v2466_v43 = vadd.f32 1e-05, %v5477_v42  ;;  %v2397_v63 = vadd.f32 1e-05, %v5450_v35 }
 0x29d   :  { %v5487_v23 = vpop.f32.mrf.mxu0  ;;  %4038 = vrcp.f32 %v2465_v2  ;;  %v2319_v18 = vadd.f32 %v2318_v0, %v2255_v62  ;;  %v2257_v16 = vand.u32 2147483647, %v2192_v48  ;;  %v2259_v49 = vand.u32 2147483647, %v2194_v41 }
 0x29e   :  { %v5489_v21 = vpop.f32.mrf.mxu1  ;;  %4040 = vlog2.f32 %v2568_v33  ;;  %v2196_v57 = vsub.f32 %v5460_v45, %v5462_v1  ;;  %v2398_v8 = vadd.f32 1e-05, %v5455_v51  ;;  %v2260_v6 = vand.u32 2147483647, %v2195_v28 }
 0x29f   :  { %v3594_v46 = vpop.f32.mrf.mxu0  ;;  %v2320_v7 = vadd.f32 %v2319_v18, %v2256_v56  ;;  %v2467_v58 = vadd.f32 1e-05, %v5489_v21  ;;  %4042 = vrcp.f32 %v2466_v43  ;;  %v2197_v3 = vsub.f32 %v5469_v11, %v5471_v15 }
 0x2a0   :  { %v3742_v5 = vpop.f32.mrf.mxu1  ;;  %v2261_v51 = vand.u32 2147483647, %v2196_v57  ;;  %v2198_v14 = vsub.f32 %v5475_v12, %v5477_v42  ;;  %v2399_v0 = vadd.f32 1e-05, %v5460_v45  ;;  %v2199_v42 = vsub.f32 %v5487_v23, %v5489_v21 }
 0x2a1   :  { %v5499_v9 = vpop.f32.mrf.mxu0  ;;  %v2321_v46 = vadd.f32 %v2320_v7, %v2257_v16  ;;  %v2570_v5 = vmul.f32 %v4027_v29, %v2396_v22  ;;  %4044 = vrcp.f32 %v2467_v58  ;;  %v2262_v48 = vand.u32 2147483647, %v2197_v3 }
 0x2a2   :  { %v5501_v59 = vpop.f32.mrf.mxu1  ;;  %v4031_v26 = vpop.eup %4030  ;;  %v2400_v18 = vadd.f32 1e-05, %v5469_v11  ;;  %v2263_v16 = vand.u32 2147483647, %v2198_v14  ;;  %v2264_v58 = vand.u32 2147483647, %v2199_v42 }
 0x2a3   :  { %v3597_v53 = vpop.f32.mrf.mxu0  ;;  %v2322_v61 = vadd.f32 %v2321_v46, %v2258_v50  ;;  %v2468_v40 = vadd.f32 1e-05, %v5501_v59  ;;  %4046 = vlog2.f32 %v2570_v5  ;;  %v2574_v32 = vmul.f32 %v4031_v26, %v2398_v8 }
 0x2a4   :  { %v3745_v27 = vpop.f32.mrf.mxu1  ;;  %v2200_v7 = vsub.f32 %v5499_v9, %v5501_v59  ;;  %v2402_v8 = vadd.f32 1e-05, %v5487_v23 }
 0x2a5   :  { %v5510_v47 = vpop.f32.mrf.mxu0  ;;  %v2572_v27 = vmul.f32 %v4029_v44, %v2397_v63  ;;  %v2323_v54 = vadd.f32 %v2322_v61, %v2259_v49  ;;  %4048 = vrcp.f32 %v2468_v40 }
 0x2a6   :  { %v5512_v37 = vpop.f32.mrf.mxu1  ;;  %v2265_v57 = vand.u32 2147483647, %v2200_v7 }
 0x2a7   :  { %v3598_v60 = vpop.f32.mrf.mxu0  ;;  %v2469_v35 = vadd.f32 1e-05, %v5512_v37  ;;  %v4033_v1 = vpop.eup %4032  ;;  %v2324_v62 = vadd.f32 %v2323_v54, %v2260_v6  ;;  %v2201_v11 = vsub.f32 %v5510_v47, %v5512_v37  ;;  %v2401_v37 = vadd.f32 1e-05, %v5475_v12 }
 0x2a8   :  { %v3746_v4 = vpop.f32.mrf.mxu1  ;;  %v4035_v38 = vpop.eup %4034  ;;  %v2694_v24 = vmul.f32 0.6931472, %v4033_v1 }
 0x2a9   :  { %v5518_v10 = vpop.f32.mrf.mxu0  ;;  %v4037_v2 = vpop.eup %4036  ;;  %4050 = vrcp.f32 %v2469_v35  ;;  %v2325_v31 = vadd.f32 %v2324_v62, %v2261_v51  ;;  %v2696_v45 = vmul.f32 0.6931472, %v4035_v38 }
 0x2aa   :  { %v5520_v36 = vpop.f32.mrf.mxu1  ;;  %v4039_v4 = vpop.eup %4038  ;;  %4052 = vlog2.f32 %v2572_v27  ;;  %v2783_v22 = vmul.f32 %v2694_v24, %v2694_v24  ;;  %v2266_v27 = vand.u32 2147483647, %v2201_v11  ;;  %v2405_v11 = vadd.f32 1e-05, %v5518_v10 }
 0x2ab   :  { %v3601_v17 = vpop.f32.mrf.mxu0  ;;  %v2470_v15 = vadd.f32 1e-05, %v5520_v36  ;;  %4054 = vlog2.f32 %v2574_v32  ;;  %v2326_v50 = vadd.f32 %v2325_v31, %v2262_v48  ;;  %v2578_v43 = vmul.f32 %v4039_v4, %v2400_v18 }
 0x2ac   :  { %v3749_v39 = vpop.f32.mrf.mxu1  ;;  %v4041_v17 = vpop.eup %4040  ;;  %v2847_v61 = vadd.f32 %v5483_v55, %v2783_v22  ;;  %v2784_v35 = vmul.f32 %v2696_v45, %v2696_v45 }
 0x2ad   :  { %v5529_v30 = vpop.f32.mrf.mxu0  ;;  %v2576_v39 = vmul.f32 %v4037_v2, %v2399_v0  ;;  %4056 = vrcp.f32 %v2470_v15  ;;  %v2698_v5 = vmul.f32 0.6931472, %v4041_v17  ;;  %v2327_v44 = vadd.f32 %v2326_v50, %v2263_v16  ;;  %v4043_v26 = vpop.eup %4042 }
 0x2ae   :  { %v5531_v25 = vpop.f32.mrf.mxu1  ;;  %v4045_v3 = vpop.eup %4044  ;;  %v2580_v23 = vmul.f32 %v4043_v26, %v2401_v37  ;;  %v2403_v15 = vadd.f32 1e-05, %v5499_v9  ;;  %v2848_v48 = vadd.f32 %v2847_v61, %v2784_v35  ;;  %v2404_v0 = vadd.f32 1e-05, %v5510_v47 }
 0x2af   :  { %v3602_v13 = vpop.f32.mrf.mxu0  ;;  %v2471_v56 = vadd.f32 1e-05, %v5531_v25  ;;  %v2328_v1 = vadd.f32 %v2327_v44, %v2264_v58  ;;  %v2785_v54 = vmul.f32 %v2698_v5, %v2698_v5  ;;  %v2203_v32 = vsub.f32 %v5529_v30, %v5531_v25 }
 0x2b0   :  { %v3750_v34 = vpop.f32.mrf.mxu1  ;;  %v2202_v13 = vsub.f32 %v5518_v10, %v5520_v36  ;;  %v4047_v36 = vpop.eup %4046  ;;  %v2582_v38 = vmul.f32 %v4045_v3, %v2402_v8 }
 0x2b1   :  { %v5541_v20 = vpop.f32.mrf.mxu0  ;;  %4058 = vrcp.f32 %v2471_v56  ;;  %v2329_v14 = vadd.f32 %v2328_v1, %v2265_v57  ;;  %v2700_v4 = vmul.f32 0.6931472, %v4047_v36  ;;  %v2268_v31 = vand.u32 2147483647, %v2203_v32 }
 0x2b2   :  { %v5543_v53 = vpop.f32.mrf.mxu1  ;;  %4060 = vlog2.f32 %v2576_v39 }
 0x2b3   :  { %v3605_v19 = vpop.f32.mrf.mxu0  ;;  %v2472_v46 = vadd.f32 1e-05, %v5543_v53  ;;  %4062 = vlog2.f32 %v2578_v43  ;;  %v2204_v2 = vsub.f32 %v5541_v20, %v5543_v53  ;;  %v2330_v42 = vadd.f32 %v2329_v14, %v2266_v27 }
 0x2b4   :  { %v3753_v52 = vpop.f32.mrf.mxu1  ;;  %v2267_v19 = vand.u32 2147483647, %v2202_v13  ;;  %v2786_v43 = vmul.f32 %v2700_v4, %v2700_v4 }
 0x2b5   :  { %v5548_v33 = vpop.f32.mrf.mxu0  ;;  %4064 = vrcp.f32 %v2472_v46  ;;  %v4049_v52 = vpop.eup %4048  ;;  %v2269_v47 = vand.u32 2147483647, %v2204_v2 }
 0x2b6   :  { %v5550_v60 = vpop.f32.mrf.mxu1  ;;  %v4051_v25 = vpop.eup %4050  ;;  %v2584_v17 = vmul.f32 %v4049_v52, %v2403_v15  ;;  %v2331_v39 = vadd.f32 %v2330_v42, %v2267_v19  ;;  %v2407_v19 = vadd.f32 1e-05, %v5541_v20  ;;  %v2408_v52 = vadd.f32 1e-05, %v5548_v33 }
 0x2b7   :  { %v3606_v29 = vpop.f32.mrf.mxu0  ;;  %v2473_v59 = vadd.f32 1e-05, %v5550_v60  ;;  %v4053_v56 = vpop.eup %4052  ;;  %v2205_v18 = vsub.f32 %v5548_v33, %v5550_v60  ;;  %v2586_v22 = vmul.f32 %v4051_v25, %v2404_v0 }
 0x2b8   :  { %v3754_v41 = vpop.f32.mrf.mxu1  ;;  %v4055_v29 = vpop.eup %4054  ;;  %v2702_v58 = vmul.f32 0.6931472, %v4053_v56  ;;  %v2332_v5 = vadd.f32 %v2331_v39, %v2268_v31 }
 0x2b9   :  { %v5559_v21 = vpop.f32.mrf.mxu0  ;;  %4066 = vrcp.f32 %v2473_v59  ;;  %v2849_v41 = vadd.f32 %v2848_v48, %v2785_v54  ;;  %v2270_v44 = vand.u32 2147483647, %v2205_v18  ;;  %v2704_v13 = vmul.f32 0.6931472, %v4055_v29 }
 0x2ba   :  { %v5561_v28 = vpop.f32.mrf.mxu1  ;;  %v4057_v7 = vpop.eup %4056  ;;  %v2333_v61 = vadd.f32 %v2332_v5, %v2269_v47  ;;  %v2787_v1 = vmul.f32 %v2702_v58, %v2702_v58  ;;  %v2409_v42 = vadd.f32 1e-05, %v5559_v21 }
 0x2bb   :  { %v3609_v63 = vpop.f32.mrf.mxu0  ;;  %v2474_v34 = vadd.f32 1e-05, %v5561_v28  ;;  %v2206_v45 = vsub.f32 %v5559_v21, %v5561_v28  ;;  %v2588_v28 = vmul.f32 %v4057_v7, %v2405_v11  ;;  %v2788_v14 = vmul.f32 %v2704_v13, %v2704_v13 }
 0x2bc   :  { %v3757_v49 = vpop.f32.mrf.mxu1  ;;  %v2334_v54 = vadd.f32 %v2333_v61, %v2270_v44 }
 0x2bd   :  { %v5573_v40 = vpop.f32.mrf.mxu0  ;;  %4068 = vrcp.f32 %v2474_v34  ;;  %v2406_v34 = vadd.f32 1e-05, %v5529_v30  ;;  %v2271_v37 = vand.u32 2147483647, %v2206_v45 }
 0x2be   :  { %v5575_v6 = vpop.f32.mrf.mxu1  ;;  %v4059_v46 = vpop.eup %4058  ;;  %v2410_v7 = vadd.f32 1e-05, %v5573_v40 }
 0x2bf   :  { %v2475_v55 = vadd.f32 1e-05, %v5575_v6  ;;  %v3610_v12 = vpop.f32.mrf.mxu0  ;;  %v2207_v59 = vsub.f32 %v5573_v40, %v5575_v6  ;;  %v4061_v26 = vpop.eup %4060  ;;  %v2850_v6 = vadd.f32 %v2849_v41, %v2786_v43  ;;  %v2590_v27 = vmul.f32 %v4059_v46, %v2406_v34 }
 0x2c0   :  { %v3758_v51 = vpop.f32.mrf.mxu1  ;;  %v4063_v35 = vpop.eup %4062  ;;  %v2335_v15 = vadd.f32 %v2334_v54, %v2271_v37  ;;  %v2706_v4 = vmul.f32 0.6931472, %v4061_v26 }
 0x2c1   :  { %v5583_v24 = vpop.f32.mrf.mxu0  ;;  %4070 = vrcp.f32 %v2475_v55  ;;  %v2272_v32 = vand.u32 2147483647, %v2207_v59  ;;  %v2708_v29 = vmul.f32 0.6931472, %v4063_v35 }
 0x2c2   :  { %v5585_v62 = vpop.f32.mrf.mxu1  ;;  %4072 = vlog2.f32 %v2580_v23  ;;  %v4065_v36 = vpop.eup %4064  ;;  %v2789_v58 = vmul.f32 %v2706_v4, %v2706_v4 }
 0x2c3   :  { %v2476_v9 = vadd.f32 1e-05, %v5585_v62  ;;  %v3613_v16 = vpop.f32.mrf.mxu0  ;;  %4074 = vlog2.f32 %v2582_v38  ;;  %v2208_v10 = vsub.f32 %v5583_v24, %v5585_v62  ;;  %v2592_v0 = vmul.f32 %v4065_v36, %v2407_v19 }
 0x2c4   :  { %v3761_v53 = vpop.f32.mrf.mxu1  ;;  %v2336_v31 = vadd.f32 %v2335_v15, %v2272_v32  ;;  %v2790_v40 = vmul.f32 %v2708_v29, %v2708_v29 }
 0x2c5   :  { %v5593_v50 = vpop.f32.mrf.mxu0  ;;  %4076 = vrcp.f32 %v2476_v9  ;;  %v2273_v2 = vand.u32 2147483647, %v2208_v10  ;;  %v2851_v53 = vadd.f32 %v2850_v6, %v2787_v1 }
 0x2c6   :  { %v2123_v60 = vpop.f32.mrf.mxu1  ;;  %4078 = vlog2.f32 %v2584_v17  ;;  %v4067_v23 = vpop.eup %4066  ;;  %v2412_v26 = vadd.f32 1e-05, %v5593_v50 }
 0x2c7   :  { %v2477_v63 = vadd.f32 1e-05, %v2123_v60  ;;  %v3614_v49 = vpop.f32.mrf.mxu0  ;;  %4080 = vlog2.f32 %v2586_v22  ;;  %v2209_v30 = vsub.f32 %v5593_v50, %v2123_v60  ;;  %v2594_v56 = vmul.f32 %v4067_v23, %v2408_v52 }
 0x2c8   :  { %v3762_v57 = vpop.f32.mrf.mxu1  ;;  %v2337_v22 = vadd.f32 %v2336_v31, %v2273_v2  ;;  %v2852_v43 = vadd.f32 %v2851_v53, %v2788_v14 }
 0x2c9   :  { %v5601_v8 = vpop.f32.mrf.mxu0  ;;  %4082 = vrcp.f32 %v2477_v63  ;;  %v2274_v18 = vand.u32 2147483647, %v2209_v30  ;;  %v2411_v57 = vadd.f32 1e-05, %v5583_v24 }
 0x2ca   :  { %v2128_v3 = vpop.f32.mrf.mxu1  ;;  %4084 = vlog2.f32 %v2588_v28  ;;  %v4069_v38 = vpop.eup %4068  ;;  %v2853_v54 = vadd.f32 %v2852_v43, %v2789_v58  ;;  %v2413_v52 = vadd.f32 1e-05, %v5601_v8 }
 0x2cb   :  { %v2478_v55 = vadd.f32 1e-05, %v2128_v3  ;;  %v3617_v12 = vpop.f32.mrf.mxu0  ;;  %v2210_v62 = vsub.f32 %v5601_v8, %v2128_v3  ;;  %v2596_v41 = vmul.f32 %v4069_v38, %v2409_v42  ;;  %v2338_v44 = vadd.f32 %v2337_v22, %v2274_v18 }
 0x2cc   :  { %v3765_v51 = vpop.f32.mrf.mxu1  ;;  %v2854_v23 = vadd.f32 %v2853_v54, %v2790_v40 }
 0x2cd   :  { %4086 = vrcp.f32 %v2478_v55  ;;  %v5607_v25 = vpop.f32.mrf.mxu0  ;;  %v2275_v47 = vand.u32 2147483647, %v2210_v62 }
 0x2ce   :  { %v2131_v48 = vpop.f32.mrf.mxu1  ;;  %4088 = vlog2.f32 %v2590_v27  ;;  %v4071_v16 = vpop.eup %4070  ;;  %v2414_v29 = vadd.f32 1e-05, %v5607_v25 }
 0x2cf   :  { %v2479_v20 = vadd.f32 1e-05, %v2131_v48  ;;  %v3618_v9 = vpop.f32.mrf.mxu0  ;;  %v2211_v17 = vsub.f32 %v5607_v25, %v2131_v48  ;;  %v4073_v39 = vpop.eup %4072  ;;  %v2598_v5 = vmul.f32 %v4071_v16, %v2410_v7  ;;  %v2339_v61 = vadd.f32 %v2338_v44, %v2275_v47 }
 0x2d0   :  { %v3766_v33 = vpop.f32.mrf.mxu1  ;;  %v4075_v60 = vpop.eup %4074  ;;  %v2710_v34 = vmul.f32 0.6931472, %v4073_v39 }
 0x2d1   :  { %4090 = vrcp.f32 %v2479_v20  ;;  %v5612_v45 = vpop.f32.mrf.mxu0  ;;  %v2276_v13 = vand.u32 2147483647, %v2211_v17  ;;  %v2712_v32 = vmul.f32 0.6931472, %v4075_v60 }
 0x2d2   :  { %v2136_v21 = vpop.f32.mrf.mxu1  ;;  %4092 = vlog2.f32 %v2592_v0  ;;  %v4077_v46 = vpop.eup %4076  ;;  %v2791_v14 = vmul.f32 %v2710_v34, %v2710_v34 }
 0x2d3   :  { %v2212_v11 = vsub.f32 %v5612_v45, %v2136_v21  ;;  %4094 = vlog2.f32 %v2594_v56  ;;  %v2480_v59 = vadd.f32 1e-05, %v2136_v21  ;;  %v3621_v63 = vpop.f32.mrf.mxu0  ;;  %v4079_v28 = vpop.eup %4078  ;;  %v2600_v35 = vmul.f32 %v4077_v46, %v2411_v57 }
 0x2d4   :  { %v3769_v49 = vpop.f32.mrf.mxu1  ;;  %4096 = vlog2.f32 %v2596_v41  ;;  %v4081_v3 = vpop.eup %4080  ;;  %v2340_v12 = vadd.f32 %v2339_v61, %v2276_v13  ;;  %v2714_v19 = vmul.f32 0.6931472, %v4079_v28  ;;  %v2792_v42 = vmul.f32 %v2712_v32, %v2712_v32 }
 0x2d5   :  { %4098 = vrcp.f32 %v2480_v59  ;;  %v5617_v37 = vpop.f32.mrf.mxu0  ;;  %v2277_v6 = vand.u32 2147483647, %v2212_v11  ;;  %v2716_v56 = vmul.f32 0.6931472, %v4081_v3  ;;  %v2855_v16 = vadd.f32 %v2854_v23, %v2791_v14 }
 0x2d6   :  { %v2139_v10 = vpop.f32.mrf.mxu1  ;;  %v4083_v36 = vpop.eup %4082  ;;  %4100 = vlog2.f32 %v2598_v5  ;;  %v2793_v53 = vmul.f32 %v2714_v19, %v2714_v19  ;;  %v2415_v63 = vadd.f32 1e-05, %v5612_v45 }
 0x2d7   :  { %v2213_v1 = vsub.f32 %v5617_v37, %v2139_v10  ;;  %v2481_v27 = vadd.f32 1e-05, %v2139_v10  ;;  %v3622_v24 = vpop.f32.mrf.mxu0  ;;  %v2602_v55 = vmul.f32 %v4083_v36, %v2412_v26  ;;  %v4085_v51 = vpop.eup %4084  ;;  %v2341_v4 = vadd.f32 %v2340_v12, %v2277_v6 }
 0x2d8   :  { %v3770_v30 = vpop.f32.mrf.mxu1  ;;  %v2718_v8 = vmul.f32 0.6931472, %v4085_v51  ;;  %v2856_v47 = vadd.f32 %v2855_v16, %v2792_v42  ;;  %v2794_v21 = vmul.f32 %v2716_v56, %v2716_v56  ;;  %v2416_v26 = vadd.f32 1e-05, %v5617_v37 }
 0x2d9   :  { %v2278_v50 = vand.u32 2147483647, %v2213_v1  ;;  %4102 = vrcp.f32 %v2481_v27  ;;  %v1750_v38 = vpop.f32.mrf.mxu0 }
 0x2da   :  { %v2144_v15 = vpop.f32.mrf.mxu1  ;;  %v4087_v2 = vpop.eup %4086  ;;  %4104 = vlog2.f32 %v2600_v35  ;;  %v2857_v44 = vadd.f32 %v2856_v47, %v2793_v53  ;;  %v2795_v59 = vmul.f32 %v2718_v8, %v2718_v8  ;;  %v2417_v54 = vadd.f32 1e-05, %v1750_v38 }
 0x2db   :  { %v2214_v62 = vsub.f32 %v1750_v38, %v2144_v15  ;;  %v2482_v48 = vadd.f32 1e-05, %v2144_v15  ;;  %v4089_v0 = vpop.eup %4088  ;;  %4106 = vlog2.f32 %v2602_v55  ;;  %v3625_v31 = vpop.f32.mrf.mxu0  ;;  %v2604_v20 = vmul.f32 %v4087_v2, %v2413_v52 }
 0x2dc   :  { %v3773_v18 = vpop.f32.mrf.mxu1  ;;  %v2342_v33 = vadd.f32 %v2341_v4, %v2278_v50  ;;  %v2720_v60 = vmul.f32 0.6931472, %v4089_v0  ;;  %v2858_v40 = vadd.f32 %v2857_v44, %v2794_v21 }
 0x2dd   :  { %4108 = vrcp.f32 %v2482_v48  ;;  %v2279_v9 = vand.u32 2147483647, %v2214_v62  ;;  %v1753_v41 = vpop.f32.mrf.mxu0 }
 0x2de   :  { %v2147_v17 = vpop.f32.mrf.mxu1  ;;  %v4091_v39 = vpop.eup %4090  ;;  %4110 = vlog2.f32 %v2604_v20  ;;  %v2796_v57 = vmul.f32 %v2720_v60, %v2720_v60  ;;  %v2859_v10 = vadd.f32 %v2858_v40, %v2795_v59 }
 0x2df   :  { %v2343_v7 = vadd.f32 %v2342_v33, %v2279_v9  ;;  %v4093_v22 = vpop.eup %4092  ;;  %v3626_v43 = vpop.f32.mrf.mxu0  ;;  %v2606_v11 = vmul.f32 %v4091_v39, %v2414_v29 }
 0x2e0   :  { %v3774_v58 = vpop.f32.mrf.mxu1  ;;  %v4095_v46 = vpop.eup %4094  ;;  %v2722_v49 = vmul.f32 0.6931472, %v4093_v22  ;;  %v2860_v27 = vadd.f32 %v2859_v10, %v2796_v57 }
 0x2e1   :  { %2344 = vadd.xlane.f32.xlu0 %v2343_v7  ;;  %v4097_v5 = vpop.eup %4096  ;;  %4112 = vlog2.f32 %v2606_v11  ;;  %v2724_v34 = vmul.f32 0.6931472, %v4095_v46 }
 0x2e2   :  { %v4099_v25 = vpop.eup %4098  ;;  %v2797_v3 = vmul.f32 %v2722_v49, %v2722_v49  ;;  %v2726_v6 = vmul.f32 0.6931472, %v4097_v5 }
 0x2e3   :  { %v2608_v13 = vmul.f32 %v4099_v25, %v2415_v63  ;;  %v4101_v28 = vpop.eup %4100  ;;  %v2798_v45 = vmul.f32 %v2724_v34, %v2724_v34 }
 0x2e4   :  { %v2728_v32 = vmul.f32 0.6931472, %v4101_v28  ;;  %v2799_v12 = vmul.f32 %v2726_v6, %v2726_v6  ;;  %v2861_v50 = vadd.f32 %v2860_v27, %v2797_v3 }
 0x2e5   :  { %4114 = vlog2.f32 %v2608_v13 }
 0x2e6   :  { %v4103_v61 = vpop.eup %4102  ;;  %v2800_v23 = vmul.f32 %v2728_v32, %v2728_v32  ;;  %v2862_v14 = vadd.f32 %v2861_v50, %v2798_v45 }
 0x2e7   :  { %v2610_v35 = vmul.f32 %v4103_v61, %v2416_v26  ;;  %v4105_v1 = vpop.eup %4104 }
 0x2e8   :  { %v4107_v36 = vpop.eup %4106  ;;  %v2730_v55 = vmul.f32 0.6931472, %v4105_v1  ;;  %v2863_v2 = vadd.f32 %v2862_v14, %v2799_v12 }
 0x2e9   :  { %4116 = vlog2.f32 %v2610_v35  ;;  %v2732_v37 = vmul.f32 0.6931472, %v4107_v36 }
 0x2ea   :  { %v4109_v24 = vpop.eup %4108  ;;  %v2801_v15 = vmul.f32 %v2730_v55, %v2730_v55  ;;  %v2864_v4 = vadd.f32 %v2863_v2, %v2800_v23 }
 0x2eb   :  { %v2612_v30 = vmul.f32 %v4109_v24, %v2417_v54  ;;  %v4111_v51 = vpop.eup %4110  ;;  %v2802_v48 = vmul.f32 %v2732_v37, %v2732_v37 }
 0x2ec   :  { %v2734_v52 = vmul.f32 0.6931472, %v4111_v51  ;;  %v2865_v42 = vadd.f32 %v2864_v4, %v2801_v15 }
 0x2ed   :  { %4118 = vlog2.f32 %v2612_v30 }
 0x2ee   :  { %v4113_v19 = vpop.eup %4112  ;;  %v2803_v0 = vmul.f32 %v2734_v52, %v2734_v52  ;;  %v2866_v18 = vadd.f32 %v2865_v42, %v2802_v48 }
 0x2ef   :  { %v2736_v62 = vmul.f32 0.6931472, %v4113_v19 }
 0x2f0   :  { %v2867_v16 = vadd.f32 %v2866_v18, %v2803_v0 }
 0x2f1   :  { %v2804_v31 = vmul.f32 %v2736_v62, %v2736_v62 }
 0x2f2   :  { %v4115_v38 = vpop.eup %4114 }
 0x2f3   :  { %v2738_v56 = vmul.f32 0.6931472, %v4115_v38  ;;  %v2868_v8 = vadd.f32 %v2867_v16, %v2804_v31 }
 0x2f5   :  { %v2805_v33 = vmul.f32 %v2738_v56, %v2738_v56 }
 0x2f6   :  { %v4117_v20 = vpop.eup %4116 }
 0x2f7   :  { %v2740_v9 = vmul.f32 0.6931472, %v4117_v20  ;;  %v2869_v17 = vadd.f32 %v2868_v8, %v2805_v33 }
 0x2f9   :  { %v2806_v53 = vmul.f32 %v2740_v9, %v2740_v9 }
 0x2fa   :  { %v4119_v29 = vpop.eup %4118 }
 0x2fb   :  { %v2742_v41 = vmul.f32 0.6931472, %v4119_v29  ;;  %v2870_v7 = vadd.f32 %v2869_v17, %v2806_v53 }
 0x2fd   :  { %v2807_v39 = vmul.f32 %v2742_v41, %v2742_v41 }
 0x2ff   :  { %v2871_v22 = vadd.f32 %v2870_v7, %v2807_v39 }
 0x301   :  { %2872 = vadd.xlane.f32.xlu0 %v2871_v22 }
 0x36a   :  { %v2345_v47 = vpop.xlane.xlu0 %2344 }
 0x36b   :  { %v2346_v21 = vrot.slane %v2345_v47, 4 }
 0x36d   :  { %v2347_v60 = vadd.f32 %v2346_v21, %v2345_v47 }
 0x36f   :  { %v2348_v43 = vrot.slane %v2347_v60, 2 }
 0x371   :  { %v2349_v58 = vadd.f32 %v2348_v43, %v2347_v60 }
 0x373   :  { %v2350_v11 = vrot.slane %v2349_v58, 1 }
 0x375   :  { %v2351_v46 = vadd.f32 %v2350_v11, %v2349_v58 }
 0x377   :  { %3775 = vpush %v2351_v46 }
 0x38a   :  { %v2873_v5 = vpop.xlane.xlu0 %2872 }
 0x38b   :  { %v2874_v44 = vrot.slane %v2873_v5, 4 }
 0x38d   :  { %v2875_v59 = vadd.f32 %v2874_v44, %v2873_v5 }
 0x38f   :  { %v2876_v63 = vrot.slane %v2875_v59, 2 }
 0x391   :  { %v2877_v25 = vadd.f32 %v2876_v63, %v2875_v59 }
 0x393   :  { %v2878_v49 = vrot.slane %v2877_v25, 1 }
 0x395   :  { %v2879_v40 = vadd.f32 %v2878_v49, %v2877_v25 }
 0x397   :  { %3777 = vpush %v2879_v40 }
 0x3a8   :  { %s3776_s0 = spop %3775 }
 0x3c8   :  { %s3778_s1 = spop %3777 }
 0x3c9   :  { %s2881_s6 = smul.f32 5.656854, %s3778_s1 }
 0x3cb   :  { %s2882_s9 = sadd.f32 %s3776_s0, %s2881_s6 }
 0x3cd   :  { %v2883_v57 = vstv %s2882_s9 }
 0x3ce   :  { %2884 = vst [vmem:[#allocation2] sm:$0x1] %v2883_v57 }
 0x3cf   :  { %4131 = shalt.err (!%p4128_p4)
}
 0x3d0   :  { %2894 = dma.vmem_to_hbm [thread:$0]  %s2892_s8, 16, %s5631_s4, [#allocation3]  }
 0x3d1   :  { %4140 = dma.done.wait [#allocation3], 16  }
 0x3d2   :  { %4141 = vsyncadd [#allocation3], 4294967280 }
 0x3d3   :  { %2898 = vsyncpa [#allocation3], 1 }

</bundles_post_ra>
